<compile_context>
chip_gen: v5e
topology: v5e:2x2
jax: 0.10.0
libtpu: 0.0.40
codegen_flags: <defaults>
</compile_context>

<pallas_src>
import functools

import jax
import jax.numpy as jnp
from jax.experimental import pallas as pl
from jax.experimental.pallas import tpu as pltpu

EPS = 1e-8  # matches torch.nn.LayerNorm(..., eps=1e-08)


def _layernorm(x, w, b, eps=EPS):
    # one-pass statistics: two independent reductions instead of two serial ones
    mu = jnp.mean(x, axis=-1, keepdims=True)
    msq = jnp.mean(x * x, axis=-1, keepdims=True)
    var = jnp.maximum(msq - mu * mu, 0.0)
    return (x - mu) * jax.lax.rsqrt(var + eps) * w + b


# row indices inside the packed (12, H) small-parameter block
_LN1_W, _LN1_B, _BQ, _BK, _BV, _BO, _LN2_W, _LN2_B, _B1, _B2, _LNF_W, _LNF_B = range(12)


# --------------------------------------------------------------------------
# Fused kernel: one grid step = one (Bt, S, H) batch tile x one encoder block.
# Activation carried in VMEM scratch across the layer axis.
# --------------------------------------------------------------------------
def _encoder_kernel(*refs, num_heads, if_gelu, has_mask, num_layers):
    it = iter(refs)
    x_ref = next(it)                               # (Bt, S, H) f32 (read at l==0)
    msk_ref = next(it)                             # (Bt, S, 1) f32 padding multiplier
    am_ref = next(it) if has_mask else None        # (S, S)    f32 additive mask
    wq_ref = next(it)                              # (1, H, H)  bf16
    wkv_ref = next(it)                             # (1, H, 2H) bf16 (Wk | Wv fused)
    wo_ref = next(it)                              # (1, H, H)  bf16
    w1_ref = next(it)                              # (1, H, H)  bf16
    w2_ref = next(it)                              # (1, H, H)  bf16
    pv_ref = next(it)                              # (1, 12, H) f32 packed small params
    o_ref = next(it)                               # (Bt, S, H) (written at l==L-1)
    acc_ref = next(it)                             # (Bt, S, H) f32 VMEM layer carry

    l = pl.program_id(1)
    Bt, S, H = x_ref.shape
    nh = num_heads
    d = H // nh
    R = Bt * S                                     # MXU M dimension
    X = Bt * nh                                    # attention batch dimension
    scale = 1.0 / (d ** 0.5)

    @pl.when(l == 0)
    def _():
        acc_ref[...] = x_ref[...].astype(jnp.float32)

    pv = pv_ref[0]                                 # (12, H)
    x2 = acc_ref[...].reshape(R, H)                # (Bt*S, H) f32

    # attention layernorm (query path only, as in the reference module)
    q_in = _layernorm(x2, pv[_LN1_W], pv[_LN1_B])

    # in-projections: bf16 operands on the MXU, f32 accumulation, M = Bt*S rows.
    q = jnp.dot(q_in.astype(jnp.bfloat16), wq_ref[0],
                preferred_element_type=jnp.float32) + pv[_BQ]
    kv = jnp.dot(x2.astype(jnp.bfloat16), wkv_ref[0],
                 preferred_element_type=jnp.float32)
    k = kv[:, :H] + pv[_BK]
    v = kv[:, H:] + pv[_BV]

    # (Bt*S, H) -> (nh*Bt, S, d): one XLU relayout per tensor + free major reshapes.
    def split_heads(t):
        t3 = pltpu.einshape("rnd->nrd", t.reshape(R, nh, d))   # (nh, Bt*S, d)
        return t3.reshape(X, S, d).astype(jnp.bfloat16)

    qh = split_heads(q)
    kh = split_heads(k)
    vh = split_heads(v)

    # TODO(synk): flash-style kv tiling (online softmax) once nh*S*S f32 logits
    # no longer fit VMEM (v7x, long sequences).
    logits = jnp.einsum("xqd,xkd->xqk", qh, kh,
                        preferred_element_type=jnp.float32) * scale
    if has_mask:
        logits = logits + am_ref[...]
    m = jnp.max(logits, axis=-1, keepdims=True)
    p = jnp.exp(logits - m)
    p = p * pl.reciprocal(jnp.sum(p, axis=-1, keepdims=True), approx=True)
    ctx = jnp.einsum("xqk,xkd->xqd", p.astype(jnp.bfloat16), vh,
                     preferred_element_type=jnp.float32)        # (nh*Bt, S, d)
    # TODO(synk): fold this head un-permute into Wo (pre-permuted rows) to save
    # one XLU relayout per layer on v5e.
    ctx = pltpu.einshape("nrd->rnd", ctx.reshape(nh, R, d)).reshape(R, H)

    mha = jnp.dot(ctx.astype(jnp.bfloat16), wo_ref[0],
                  preferred_element_type=jnp.float32) + pv[_BO]

    # residual: seqs = Q + mha_outputs, then feed-forward layernorm
    h1 = _layernorm(q_in + mha, pv[_LN2_W], pv[_LN2_B])

    # PointWiseFeedForward (if_point_wise=False -> Linear/act/Linear + residual)
    f = jnp.dot(h1.astype(jnp.bfloat16), w1_ref[0],
                preferred_element_type=jnp.float32) + pv[_B1]
    # tanh-form GELU runs on the EUP slot (hidden under the FFN matmul)
    f = jax.nn.gelu(f, approximate=True) if if_gelu else jnp.maximum(f, 0.0)
    f = jnp.dot(f.astype(jnp.bfloat16), w2_ref[0],
                preferred_element_type=jnp.float32) + pv[_B2]

    y = (f + h1).reshape(Bt, S, H) * msk_ref[...]  # seqs *= ~key_padding_mask
    acc_ref[...] = y                               # carry to next layer (stays in VMEM)

    # final LayerNorm fused into the last layer; single HBM writeback per tile
    @pl.when(l == num_layers - 1)
    def _():
        yf = _layernorm(y.reshape(R, H), pv[_LNF_W], pv[_LNF_B])
        o_ref[...] = yf.reshape(Bt, S, H).astype(o_ref.dtype)


# --------------------------------------------------------------------------
# pallas_call wrapper
# --------------------------------------------------------------------------
def _pick_batch_tile(B, S):
    """Largest divisor of B that keeps Bt*S <= ~1024 MXU rows; prefer >=2 grid
    points (v7x megacore) when that does not starve the MXU M dimension."""
    divisors = [c for c in range(1, B + 1) if B % c == 0]
    fits = [c for c in divisors if c * S <= 1024] or [1]
    bt = max(fits)
    if bt == B and B > 1:
        smaller = [c for c in divisors if c < B and c * S >= 256]
        if smaller:
            bt = max(smaller)
    return bt


def _encoder_call(x, mask_mult, attn_mask, p, num_heads, if_gelu):
    B, S, H = x.shape
    L = int(p["wq"].shape[0])
    nh = num_heads
    has_mask = attn_mask is not None
    bt = _pick_batch_tile(B, S)
    nb = B // bt

    kern = functools.partial(_encoder_kernel, num_heads=num_heads,
                             if_gelu=if_gelu, has_mask=has_mask, num_layers=L)

    # batch-tile blocks: constant across the layer axis -> fetched once per tile
    in_specs = [pl.BlockSpec((bt, S, H), lambda b, l: (b, 0, 0)),
                pl.BlockSpec((bt, S, 1), lambda b, l: (b, 0, 0))]
    operands = [x, mask_mult]
    if has_mask:
        in_specs.append(pl.BlockSpec((S, S), lambda b, l: (0, 0)))
        operands.append(attn_mask.astype(jnp.float32))
    # per-layer weight blocks stream along the 'arbitrary' layer axis
    for name in ("wq", "wkv", "wo", "w1", "w2", "pvec"):
        arr = p[name]
        in_specs.append(pl.BlockSpec((1,) + arr.shape[1:], lambda b, l: (l, 0, 0)))
        operands.append(arr)

    # VMEM budget: double-buffered pipeline blocks + layer-resident carry +
    # in-kernel f32 intermediates (projections, kv, logits, probabilities).
    row = bt * S * H * 4
    block_bytes = 2 * (2 * row + bt * S * 4
                       + (S * S * 4 if has_mask else 0)
                       + 6 * H * H * 2 + 12 * H * 4)
    inter_bytes = 10 * row + bt * S * 2 * H * 4 + 2 * bt * nh * S * S * 4
    need = block_bytes + row + inter_bytes + (4 << 20)
    try:
        cap = int(pltpu.get_tpu_info().vmem_capacity_bytes * 0.9)
    except Exception:
        cap = 56 * 1024 * 1024
    vmem_limit = int(min(max(32 * 1024 * 1024, need), cap))

    cost = pl.CostEstimate(
        flops=int(B * L * (12 * S * H * H + 4 * S * S * H)),
        transcendentals=int(B * L * nh * S * S),
        bytes_accessed=int(2 * B * S * H * 4 + B * S * 4
                           + nb * L * (12 * H * H + 48 * H)
                           + (S * S * 4 if has_mask else 0)))

    return pl.pallas_call(
        kern,
        out_shape=jax.ShapeDtypeStruct((B, S, H), x.dtype),
        grid=(nb, L),
        in_specs=in_specs,
        out_specs=pl.BlockSpec((bt, S, H), lambda b, l: (b, 0, 0)),
        scratch_shapes=[pltpu.VMEM((bt, S, H), jnp.float32)],
        compiler_params=pltpu.CompilerParams(
            dimension_semantics=("parallel", "arbitrary"),
            vmem_limit_bytes=vmem_limit),
        cost_estimate=cost,
    )(*operands)


def pack_params(params):
    """Stack per-layer params into streamed (L, ...) arrays: bf16 weight
    matrices, fused (H, 2H) K/V projection, one (12, H) f32 small-param block
    per layer (final-LN params replicated into every layer's block)."""
    blocks = params["blocks"]
    lnf_w, lnf_b = params["lnf_w"][0], params["lnf_b"][0]
    wq, wkv, wo, w1, w2, pvecs = [], [], [], [], [], []
    for p in blocks:
        wq.append(p["wq"])
        wkv.append(jnp.concatenate([p["wk"], p["wv"]], axis=1))
        wo.append(p["wo"])
        w1.append(p["w1"])
        w2.append(p["w2"])
        pvecs.append(jnp.stack([
            p["ln1_w"][0], p["ln1_b"][0],
            p["bq"][0], p["bk"][0], p["bv"][0], p["bo"][0],
            p["ln2_w"][0], p["ln2_b"][0],
            p["b1"][0], p["b2"][0],
            lnf_w, lnf_b,
        ]))
    st = lambda xs, dt: jnp.stack(xs).astype(dt)
    return dict(
        wq=st(wq, jnp.bfloat16), wkv=st(wkv, jnp.bfloat16), wo=st(wo, jnp.bfloat16),
        w1=st(w1, jnp.bfloat16), w2=st(w2, jnp.bfloat16),
        pvec=st(pvecs, jnp.float32),
    )


def encoder_layer(seqs, params, key_padding_mask, attn_mask=None,
                  num_heads=4, if_gelu=False):
    """Pallas Encoder_layer.forward (inference). seqs: (B, S, H) float32."""
    packed = pack_params(params)
    mask_mult = (~key_padding_mask).astype(seqs.dtype)[..., None]   # (B, S, 1)
    return _encoder_call(seqs, mask_mult, attn_mask, packed, num_heads, if_gelu)


# --------------------------------------------------------------------------
# Deterministic synthetic parameters (shapes per Encoder_layer.__init__)
# --------------------------------------------------------------------------
def init_params(key, block_nums, hidden_units):
    H = hidden_units
    one = jnp.ones((1, H), jnp.float32)
    zero = jnp.zeros((1, H), jnp.float32)
    mat = lambda k: jax.random.normal(k, (H, H), jnp.float32) * 0.05
    vec = lambda k: jax.random.normal(k, (1, H), jnp.float32) * 0.02
    blocks = []
    for i in range(block_nums):
        ks = jax.random.split(jax.random.fold_in(key, i), 12)
        blocks.append(dict(
            ln1_w=one, ln1_b=zero,
            wq=mat(ks[0]), bq=vec(ks[1]),
            wk=mat(ks[2]), bk=vec(ks[3]),
            wv=mat(ks[4]), bv=vec(ks[5]),
            wo=mat(ks[6]), bo=vec(ks[7]),
            ln2_w=one, ln2_b=zero,
            w1=mat(ks[8]), b1=vec(ks[9]),
            w2=mat(ks[10]), b2=vec(ks[11]),
        ))
    return dict(blocks=blocks, lnf_w=one, lnf_b=zero)


# --------------------------------------------------------------------------
# Pure-JAX f32 reference (mirrors the PyTorch forward, inference mode)
# --------------------------------------------------------------------------
def _layernorm_ref(x, w, b, eps=EPS):
    mu = jnp.mean(x, axis=-1, keepdims=True)
    var = jnp.mean(jnp.square(x - mu), axis=-1, keepdims=True)
    return (x - mu) * jax.lax.rsqrt(var + eps) * w + b


def encoder_ref(seqs, params, key_padding_mask, attn_mask, num_heads, if_gelu=False):
    B, S, H = seqs.shape
    d = H // num_heads
    am = jnp.zeros((S, S), jnp.float32) if attn_mask is None else attn_mask
    mask_mult = (~key_padding_mask).astype(seqs.dtype)[..., None]
    x = seqs
    for p in params["blocks"]:
        q_in = _layernorm_ref(x, p["ln1_w"][0], p["ln1_b"][0])
        q = q_in @ p["wq"] + p["bq"][0]
        k = x @ p["wk"] + p["bk"][0]
        v = x @ p["wv"] + p["bv"][0]
        qh = q.reshape(B, S, num_heads, d)
        kh = k.reshape(B, S, num_heads, d)
        vh = v.reshape(B, S, num_heads, d)
        logits = jnp.einsum("bqhd,bkhd->bhqk", qh, kh) / jnp.sqrt(d) + am
        w = jax.nn.softmax(logits, axis=-1)
        ctx = jnp.einsum("bhqk,bkhd->bqhd", w, vh).reshape(B, S, H)
        mha = ctx @ p["wo"] + p["bo"][0]
        h1 = _layernorm_ref(q_in + mha, p["ln2_w"][0], p["ln2_b"][0])
        f = h1 @ p["w1"] + p["b1"][0]
        f = jax.nn.gelu(f, approximate=False) if if_gelu else jnp.maximum(f, 0.0)
        f = f @ p["w2"] + p["b2"][0]
        x = (f + h1) * mask_mult
    return _layernorm_ref(x, params["lnf_w"][0], params["lnf_b"][0])


if __name__ == "__main__":
    B, S, H, HEADS, BLOCKS = 2, 8, 32, 4, 2

    key = jax.random.PRNGKey(0)
    kx, kp = jax.random.split(key)
    seqs = jax.random.normal(kx, (B, S, H), jnp.float32)
    params = init_params(kp, BLOCKS, H)
    # last two positions of every sequence are padding (True = padded)
    key_padding_mask = jnp.zeros((B, S), dtype=bool).at[:, -2:].set(True)

    out = encoder_layer(seqs, params, key_padding_mask,
                        attn_mask=None, num_heads=HEADS)
    out = jax.block_until_ready(out)

    ref = encoder_ref(seqs, params, key_padding_mask, None, HEADS)
    assert out.shape == (B, S, H)
    # tolerance accounts for the bf16 MXU path + approx softmax reciprocal
    err = float(jnp.max(jnp.abs(out - ref)))
    assert jnp.allclose(out, ref, atol=3e-2, rtol=3e-2), err
    print("KERNEL_OK")
</pallas_src>

<mosaic_0001>
module attributes {stable_mosaic.version = 11 : i64} {
  func.func @_encoder_kernel(%arg0: i32, %arg1: i32, %arg2: memref<2x8x32xf32, #tpu.memory_space<vmem>>, %arg3: memref<2x8x1xf32, #tpu.memory_space<vmem>>, %arg4: memref<1x32x32xbf16, #tpu.memory_space<vmem>>, %arg5: memref<1x32x64xbf16, #tpu.memory_space<vmem>>, %arg6: memref<1x32x32xbf16, #tpu.memory_space<vmem>>, %arg7: memref<1x32x32xbf16, #tpu.memory_space<vmem>>, %arg8: memref<1x32x32xbf16, #tpu.memory_space<vmem>>, %arg9: memref<1x12x32xf32, #tpu.memory_space<vmem>>, %arg10: memref<2x8x32xf32, #tpu.memory_space<vmem>>, %arg11: memref<2x8x32xf32, #tpu.memory_space<vmem>>) attributes {dimension_semantics = [#tpu.dimension_semantics<parallel>, #tpu.dimension_semantics<arbitrary>], iteration_bounds = array<i64: 1, 2>, scalar_prefetch = 0 : i64, scratch_operands = 1 : i64, tpu.core_type = #tpu.core_type<tc>, window_params = [{transform_indices = @transform_0, window_bounds = array<i64: 2, 8, 32>}, {transform_indices = @transform_1, window_bounds = array<i64: 2, 8, 1>}, {transform_indices = @transform_2, window_bounds = array<i64: 1, 32, 32>}, {transform_indices = @transform_3, window_bounds = array<i64: 1, 32, 64>}, {transform_indices = @transform_4, window_bounds = array<i64: 1, 32, 32>}, {transform_indices = @transform_5, window_bounds = array<i64: 1, 32, 32>}, {transform_indices = @transform_6, window_bounds = array<i64: 1, 32, 32>}, {transform_indices = @transform_7, window_bounds = array<i64: 1, 12, 32>}, {transform_indices = @transform_8, window_bounds = array<i64: 2, 8, 32>}]} {
    %c0_i32 = arith.constant 0 : i32
    %0 = arith.cmpi eq, %arg1, %c0_i32 : i32
    %1 = arith.extui %0 : i1 to i32
    %c0_i32_0 = arith.constant 0 : i32
    %2 = arith.cmpi ne, %1, %c0_i32_0 : i32
    scf.if %2 {
      %c0_50 = arith.constant 0 : index
      %c0_51 = arith.constant 0 : index
      %c0_52 = arith.constant 0 : index
      %161 = vector.load %arg2[%c0_50, %c0_51, %c0_52] : memref<2x8x32xf32, #tpu.memory_space<vmem>>, vector<2x8x32xf32>
      %c0_53 = arith.constant 0 : index
      %c0_54 = arith.constant 0 : index
      %c0_55 = arith.constant 0 : index
      %162 = vector.load %arg11[%c0_53, %c0_54, %c0_55] : memref<2x8x32xf32, #tpu.memory_space<vmem>>, vector<2x8x32xf32>
      tpu.vector_store %arg11[%c0_53, %c0_54, %c0_55], %161 {strides = array<i32>} : memref<2x8x32xf32, #tpu.memory_space<vmem>>, vector<2x8x32xf32>,
    } else {
    }
    %c0 = arith.constant 0 : index
    %c0_1 = arith.constant 0 : index
    %c0_2 = arith.constant 0 : index
    %3 = vector.load %arg9[%c0, %c0_1, %c0_2] : memref<1x12x32xf32, #tpu.memory_space<vmem>>, vector<1x12x32xf32>
    %4 = vector.shape_cast %3 : vector<1x12x32xf32> to vector<12x32xf32>
    %c0_3 = arith.constant 0 : index
    %c0_4 = arith.constant 0 : index
    %c0_5 = arith.constant 0 : index
    %5 = vector.load %arg11[%c0_3, %c0_4, %c0_5] : memref<2x8x32xf32, #tpu.memory_space<vmem>>, vector<2x8x32xf32>
    %6 = vector.shape_cast %5 : vector<2x8x32xf32> to vector<16x32xf32>
    %7 = vector.extract_strided_slice %4 {offsets = [0, 0], sizes = [1, 32], strides = [1, 1]} : vector<12x32xf32> to vector<1x32xf32>
    %8 = vector.shape_cast %7 : vector<1x32xf32> to vector<32xf32>
    %9 = vector.extract_strided_slice %4 {offsets = [1, 0], sizes = [1, 32], strides = [1, 1]} : vector<12x32xf32> to vector<1x32xf32>
    %10 = vector.shape_cast %9 : vector<1x32xf32> to vector<32xf32>
    %cst = arith.constant dense<0.000000e+00> : vector<16xf32>
    %11 = vector.multi_reduction <add>, %6, %cst [1] : vector<16x32xf32> to vector<16xf32>
    %12 = vector.shape_cast %11 : vector<16xf32> to vector<16x1xf32>
    %cst_6 = arith.constant 3.200000e+01 : f32
    %13 = vector.broadcast %cst_6 : f32 to vector<16x1xf32>
    %14 = arith.divf %12, %13 : vector<16x1xf32>
    %15 = arith.mulf %6, %6 : vector<16x32xf32>
    %cst_7 = arith.constant dense<0.000000e+00> : vector<16xf32>
    %16 = vector.multi_reduction <add>, %15, %cst_7 [1] : vector<16x32xf32> to vector<16xf32>
    %17 = vector.shape_cast %16 : vector<16xf32> to vector<16x1xf32>
    %cst_8 = arith.constant 3.200000e+01 : f32
    %18 = vector.broadcast %cst_8 : f32 to vector<16x1xf32>
    %19 = arith.divf %17, %18 : vector<16x1xf32>
    %20 = arith.mulf %14, %14 : vector<16x1xf32>
    %21 = arith.subf %19, %20 : vector<16x1xf32>
    %cst_9 = arith.constant 0.000000e+00 : f32
    %22 = vector.broadcast %cst_9 : f32 to vector<16x1xf32>
    %23 = arith.maximumf %21, %22 : vector<16x1xf32>
    %24 = vector.broadcast %14 : vector<16x1xf32> to vector<16x32xf32>
    %25 = arith.subf %6, %24 : vector<16x32xf32>
    %cst_10 = arith.constant 9.99999993E-9 : f32
    %26 = vector.broadcast %cst_10 : f32 to vector<16x1xf32>
    %27 = arith.addf %23, %26 : vector<16x1xf32>
    %28 = math.rsqrt %27 : vector<16x1xf32>
    %29 = vector.broadcast %28 : vector<16x1xf32> to vector<16x32xf32>
    %30 = arith.mulf %25, %29 : vector<16x32xf32>
    %31 = vector.shape_cast %8 : vector<32xf32> to vector<1x32xf32>
    %32 = vector.broadcast %31 : vector<1x32xf32> to vector<16x32xf32>
    %33 = arith.mulf %30, %32 : vector<16x32xf32>
    %34 = vector.shape_cast %10 : vector<32xf32> to vector<1x32xf32>
    %35 = vector.broadcast %34 : vector<1x32xf32> to vector<16x32xf32>
    %36 = arith.addf %33, %35 : vector<16x32xf32>
    %37 = arith.truncf %36 : vector<16x32xf32> to vector<16x32xbf16>
    %c0_11 = arith.constant 0 : index
    %c0_12 = arith.constant 0 : index
    %c0_13 = arith.constant 0 : index
    %38 = vector.load %arg4[%c0_11, %c0_12, %c0_13] : memref<1x32x32xbf16, #tpu.memory_space<vmem>>, vector<1x32x32xbf16>
    %39 = vector.shape_cast %38 : vector<1x32x32xbf16> to vector<32x32xbf16>
    %cst_14 = arith.constant dense<0.000000e+00> : vector<16x32xf32>
    %40 = tpu.matmul %37, %39, %cst_14 {dimension_numbers = #tpu.dot_dimension_numbers<[1], [0], [0], [1], [0, 0, 1, 1], [], []>} : vector<16x32xbf16>, vector<32x32xbf16>, vector<16x32xf32> -> vector<16x32xf32>
    %41 = vector.extract_strided_slice %4 {offsets = [2, 0], sizes = [1, 32], strides = [1, 1]} : vector<12x32xf32> to vector<1x32xf32>
    %42 = vector.shape_cast %41 : vector<1x32xf32> to vector<32xf32>
    %43 = vector.shape_cast %42 : vector<32xf32> to vector<1x32xf32>
    %44 = vector.broadcast %43 : vector<1x32xf32> to vector<16x32xf32>
    %45 = arith.addf %40, %44 : vector<16x32xf32>
    %46 = arith.truncf %6 : vector<16x32xf32> to vector<16x32xbf16>
    %c0_15 = arith.constant 0 : index
    %c0_16 = arith.constant 0 : index
    %c0_17 = arith.constant 0 : index
    %47 = vector.load %arg5[%c0_15, %c0_16, %c0_17] : memref<1x32x64xbf16, #tpu.memory_space<vmem>>, vector<1x32x64xbf16>
    %48 = vector.shape_cast %47 : vector<1x32x64xbf16> to vector<32x64xbf16>
    %cst_18 = arith.constant dense<0.000000e+00> : vector<16x64xf32>
    %49 = tpu.matmul %46, %48, %cst_18 {dimension_numbers = #tpu.dot_dimension_numbers<[1], [0], [0], [1], [0, 0, 1, 1], [], []>} : vector<16x32xbf16>, vector<32x64xbf16>, vector<16x64xf32> -> vector<16x64xf32>
    %50 = vector.extract_strided_slice %49 {offsets = [0, 0], sizes = [16, 32], strides = [1, 1]} : vector<16x64xf32> to vector<16x32xf32>
    %51 = vector.extract_strided_slice %4 {offsets = [3, 0], sizes = [1, 32], strides = [1, 1]} : vector<12x32xf32> to vector<1x32xf32>
    %52 = vector.shape_cast %51 : vector<1x32xf32> to vector<32xf32>
    %53 = vector.shape_cast %52 : vector<32xf32> to vector<1x32xf32>
    %54 = vector.broadcast %53 : vector<1x32xf32> to vector<16x32xf32>
    %55 = arith.addf %50, %54 : vector<16x32xf32>
    %56 = vector.extract_strided_slice %49 {offsets = [0, 32], sizes = [16, 32], strides = [1, 1]} : vector<16x64xf32> to vector<16x32xf32>
    %57 = vector.extract_strided_slice %4 {offsets = [4, 0], sizes = [1, 32], strides = [1, 1]} : vector<12x32xf32> to vector<1x32xf32>
    %58 = vector.shape_cast %57 : vector<1x32xf32> to vector<32xf32>
    %59 = vector.shape_cast %58 : vector<32xf32> to vector<1x32xf32>
    %60 = vector.broadcast %59 : vector<1x32xf32> to vector<16x32xf32>
    %61 = arith.addf %56, %60 : vector<16x32xf32>
    %62 = vector.shape_cast %45 : vector<16x32xf32> to vector<16x4x8xf32>
    %63 = tpu.transpose %62, [1, 0, 2] : vector<16x4x8xf32> -> vector<4x16x8xf32>
    %64 = vector.shape_cast %63 : vector<4x16x8xf32> to vector<8x8x8xf32>
    %65 = arith.truncf %64 : vector<8x8x8xf32> to vector<8x8x8xbf16>
    %66 = vector.shape_cast %55 : vector<16x32xf32> to vector<16x4x8xf32>
    %67 = tpu.transpose %66, [1, 0, 2] : vector<16x4x8xf32> -> vector<4x16x8xf32>
    %68 = vector.shape_cast %67 : vector<4x16x8xf32> to vector<8x8x8xf32>
    %69 = arith.truncf %68 : vector<8x8x8xf32> to vector<8x8x8xbf16>
    %70 = vector.shape_cast %61 : vector<16x32xf32> to vector<16x4x8xf32>
    %71 = tpu.transpose %70, [1, 0, 2] : vector<16x4x8xf32> -> vector<4x16x8xf32>
    %72 = vector.shape_cast %71 : vector<4x16x8xf32> to vector<8x8x8xf32>
    %73 = arith.truncf %72 : vector<8x8x8xf32> to vector<8x8x8xbf16>
    "tpu.trace_start"() <{level = 10 : i32, message = "xqd,xkd->xqk"}> : () -> ()
    %cst_19 = arith.constant dense<0.000000e+00> : vector<8x8x8xf32>
    %74 = tpu.matmul %65, %69, %cst_19 {dimension_numbers = #tpu.dot_dimension_numbers<[2], [2], [1], [1], [0, 0, 0, 1, 1, 1], [0], [0]>} : vector<8x8x8xbf16>, vector<8x8x8xbf16>, vector<8x8x8xf32> -> vector<8x8x8xf32>
    "tpu.trace_stop"() : () -> ()
    %cst_20 = arith.constant 0.353553385 : f32
    %75 = vector.broadcast %cst_20 : f32 to vector<8x8x8xf32>
    %76 = arith.mulf %74, %75 : vector<8x8x8xf32>
    %cst_21 = arith.constant dense<0xFF800000> : vector<8x8xf32>
    %77 = vector.multi_reduction <maximumf>, %76, %cst_21 [2] : vector<8x8x8xf32> to vector<8x8xf32>
    %78 = vector.shape_cast %77 : vector<8x8xf32> to vector<8x8x1xf32>
    %79 = vector.broadcast %78 : vector<8x8x1xf32> to vector<8x8x8xf32>
    %80 = arith.subf %76, %79 : vector<8x8x8xf32>
    %81 = math.exp %80 : vector<8x8x8xf32>
    %cst_22 = arith.constant dense<0.000000e+00> : vector<8x8xf32>
    %82 = vector.multi_reduction <add>, %81, %cst_22 [2] : vector<8x8x8xf32> to vector<8x8xf32>
    %83 = vector.shape_cast %82 : vector<8x8xf32> to vector<8x8x1xf32>
    %84 = tpu.reciprocal %83 {approx = true} : vector<8x8x1xf32> -> vector<8x8x1xf32>
    %85 = vector.broadcast %84 : vector<8x8x1xf32> to vector<8x8x8xf32>
    %86 = arith.mulf %81, %85 : vector<8x8x8xf32>
    %87 = arith.truncf %86 : vector<8x8x8xf32> to vector<8x8x8xbf16>
    "tpu.trace_start"() <{level = 10 : i32, message = "xqk,xkd->xqd"}> : () -> ()
    %cst_23 = arith.constant dense<0.000000e+00> : vector<8x8x8xf32>
    %88 = tpu.matmul %87, %73, %cst_23 {dimension_numbers = #tpu.dot_dimension_numbers<[2], [1], [1], [2], [0, 0, 0, 1, 1, 2], [0], [0]>} : vector<8x8x8xbf16>, vector<8x8x8xbf16>, vector<8x8x8xf32> -> vector<8x8x8xf32>
    "tpu.trace_stop"() : () -> ()
    %89 = vector.shape_cast %88 : vector<8x8x8xf32> to vector<4x16x8xf32>
    %90 = tpu.transpose %89, [1, 0, 2] : vector<4x16x8xf32> -> vector<16x4x8xf32>
    %91 = vector.shape_cast %90 : vector<16x4x8xf32> to vector<16x32xf32>
    %92 = arith.truncf %91 : vector<16x32xf32> to vector<16x32xbf16>
    %c0_24 = arith.constant 0 : index
    %c0_25 = arith.constant 0 : index
    %c0_26 = arith.constant 0 : index
    %93 = vector.load %arg6[%c0_24, %c0_25, %c0_26] : memref<1x32x32xbf16, #tpu.memory_space<vmem>>, vector<1x32x32xbf16>
    %94 = vector.shape_cast %93 : vector<1x32x32xbf16> to vector<32x32xbf16>
    %cst_27 = arith.constant dense<0.000000e+00> : vector<16x32xf32>
    %95 = tpu.matmul %92, %94, %cst_27 {dimension_numbers = #tpu.dot_dimension_numbers<[1], [0], [0], [1], [0, 0, 1, 1], [], []>} : vector<16x32xbf16>, vector<32x32xbf16>, vector<16x32xf32> -> vector<16x32xf32>
    %96 = vector.extract_strided_slice %4 {offsets = [5, 0], sizes = [1, 32], strides = [1, 1]} : vector<12x32xf32> to vector<1x32xf32>
    %97 = vector.shape_cast %96 : vector<1x32xf32> to vector<32xf32>
    %98 = vector.shape_cast %97 : vector<32xf32> to vector<1x32xf32>
    %99 = vector.broadcast %98 : vector<1x32xf32> to vector<16x32xf32>
    %100 = arith.addf %95, %99 : vector<16x32xf32>
    %101 = arith.addf %36, %100 : vector<16x32xf32>
    %102 = vector.extract_strided_slice %4 {offsets = [6, 0], sizes = [1, 32], strides = [1, 1]} : vector<12x32xf32> to vector<1x32xf32>
    %103 = vector.shape_cast %102 : vector<1x32xf32> to vector<32xf32>
    %104 = vector.extract_strided_slice %4 {offsets = [7, 0], sizes = [1, 32], strides = [1, 1]} : vector<12x32xf32> to vector<1x32xf32>
    %105 = vector.shape_cast %104 : vector<1x32xf32> to vector<32xf32>
    %cst_28 = arith.constant dense<0.000000e+00> : vector<16xf32>
    %106 = vector.multi_reduction <add>, %101, %cst_28 [1] : vector<16x32xf32> to vector<16xf32>
    %107 = vector.shape_cast %106 : vector<16xf32> to vector<16x1xf32>
    %cst_29 = arith.constant 3.200000e+01 : f32
    %108 = vector.broadcast %cst_29 : f32 to vector<16x1xf32>
    %109 = arith.divf %107, %108 : vector<16x1xf32>
    %110 = arith.mulf %101, %101 : vector<16x32xf32>
    %cst_30 = arith.constant dense<0.000000e+00> : vector<16xf32>
    %111 = vector.multi_reduction <add>, %110, %cst_30 [1] : vector<16x32xf32> to vector<16xf32>
    %112 = vector.shape_cast %111 : vector<16xf32> to vector<16x1xf32>
    %cst_31 = arith.constant 3.200000e+01 : f32
    %113 = vector.broadcast %cst_31 : f32 to vector<16x1xf32>
    %114 = arith.divf %112, %113 : vector<16x1xf32>
    %115 = arith.mulf %109, %109 : vector<16x1xf32>
    %116 = arith.subf %114, %115 : vector<16x1xf32>
    %cst_32 = arith.constant 0.000000e+00 : f32
    %117 = vector.broadcast %cst_32 : f32 to vector<16x1xf32>
    %118 = arith.maximumf %116, %117 : vector<16x1xf32>
    %119 = vector.broadcast %109 : vector<16x1xf32> to vector<16x32xf32>
    %120 = arith.subf %101, %119 : vector<16x32xf32>
    %cst_33 = arith.constant 9.99999993E-9 : f32
    %121 = vector.broadcast %cst_33 : f32 to vector<16x1xf32>
    %122 = arith.addf %118, %121 : vector<16x1xf32>
    %123 = math.rsqrt %122 : vector<16x1xf32>
    %124 = vector.broadcast %123 : vector<16x1xf32> to vector<16x32xf32>
    %125 = arith.mulf %120, %124 : vector<16x32xf32>
    %126 = vector.shape_cast %103 : vector<32xf32> to vector<1x32xf32>
    %127 = vector.broadcast %126 : vector<1x32xf32> to vector<16x32xf32>
    %128 = arith.mulf %125, %127 : vector<16x32xf32>
    %129 = vector.shape_cast %105 : vector<32xf32> to vector<1x32xf32>
    %130 = vector.broadcast %129 : vector<1x32xf32> to vector<16x32xf32>
    %131 = arith.addf %128, %130 : vector<16x32xf32>
    %132 = arith.truncf %131 : vector<16x32xf32> to vector<16x32xbf16>
    %c0_34 = arith.constant 0 : index
    %c0_35 = arith.constant 0 : index
    %c0_36 = arith.constant 0 : index
    %133 = vector.load %arg7[%c0_34, %c0_35, %c0_36] : memref<1x32x32xbf16, #tpu.memory_space<vmem>>, vector<1x32x32xbf16>
    %134 = vector.shape_cast %133 : vector<1x32x32xbf16> to vector<32x32xbf16>
    %cst_37 = arith.constant dense<0.000000e+00> : vector<16x32xf32>
    %135 = tpu.matmul %132, %134, %cst_37 {dimension_numbers = #tpu.dot_dimension_numbers<[1], [0], [0], [1], [0, 0, 1, 1], [], []>} : vector<16x32xbf16>, vector<32x32xbf16>, vector<16x32xf32> -> vector<16x32xf32>
    %136 = vector.extract_strided_slice %4 {offsets = [8, 0], sizes = [1, 32], strides = [1, 1]} : vector<12x32xf32> to vector<1x32xf32>
    %137 = vector.shape_cast %136 : vector<1x32xf32> to vector<32xf32>
    %138 = vector.shape_cast %137 : vector<32xf32> to vector<1x32xf32>
    %139 = vector.broadcast %138 : vector<1x32xf32> to vector<16x32xf32>
    %140 = arith.addf %135, %139 : vector<16x32xf32>
    %cst_38 = arith.constant 0.000000e+00 : f32
    %141 = vector.broadcast %cst_38 : f32 to vector<16x32xf32>
    %142 = arith.maximumf %140, %141 : vector<16x32xf32>
    %143 = arith.truncf %142 : vector<16x32xf32> to vector<16x32xbf16>
    %c0_39 = arith.constant 0 : index
    %c0_40 = arith.constant 0 : index
    %c0_41 = arith.constant 0 : index
    %144 = vector.load %arg8[%c0_39, %c0_40, %c0_41] : memref<1x32x32xbf16, #tpu.memory_space<vmem>>, vector<1x32x32xbf16>
    %145 = vector.shape_cast %144 : vector<1x32x32xbf16> to vector<32x32xbf16>
    %cst_42 = arith.constant dense<0.000000e+00> : vector<16x32xf32>
    %146 = tpu.matmul %143, %145, %cst_42 {dimension_numbers = #tpu.dot_dimension_numbers<[1], [0], [0], [1], [0, 0, 1, 1], [], []>} : vector<16x32xbf16>, vector<32x32xbf16>, vector<16x32xf32> -> vector<16x32xf32>
    %147 = vector.extract_strided_slice %4 {offsets = [9, 0], sizes = [1, 32], strides = [1, 1]} : vector<12x32xf32> to vector<1x32xf32>
    %148 = vector.shape_cast %147 : vector<1x32xf32> to vector<32xf32>
    %149 = vector.shape_cast %148 : vector<32xf32> to vector<1x32xf32>
    %150 = vector.broadcast %149 : vector<1x32xf32> to vector<16x32xf32>
    %151 = arith.addf %146, %150 : vector<16x32xf32>
    %152 = arith.addf %151, %131 : vector<16x32xf32>
    %153 = vector.shape_cast %152 : vector<16x32xf32> to vector<2x8x32xf32>
    %c0_43 = arith.constant 0 : index
    %c0_44 = arith.constant 0 : index
    %c0_45 = arith.constant 0 : index
    %154 = vector.load %arg3[%c0_43, %c0_44, %c0_45] : memref<2x8x1xf32, #tpu.memory_space<vmem>>, vector<2x8x1xf32>
    %155 = vector.broadcast %154 : vector<2x8x1xf32> to vector<2x8x32xf32>
    %156 = arith.mulf %153, %155 : vector<2x8x32xf32>
    %c0_46 = arith.constant 0 : index
    %c0_47 = arith.constant 0 : index
    %c0_48 = arith.constant 0 : index
    %157 = vector.load %arg11[%c0_46, %c0_47, %c0_48] : memref<2x8x32xf32, #tpu.memory_space<vmem>>, vector<2x8x32xf32>
    tpu.vector_store %arg11[%c0_46, %c0_47, %c0_48], %156 {strides = array<i32>} : memref<2x8x32xf32, #tpu.memory_space<vmem>>, vector<2x8x32xf32>,
    %c1_i32 = arith.constant 1 : i32
    %158 = arith.cmpi eq, %arg1, %c1_i32 : i32
    %159 = arith.extui %158 : i1 to i32
    %c0_i32_49 = arith.constant 0 : i32
    %160 = arith.cmpi ne, %159, %c0_i32_49 : i32
    scf.if %160 {
      %161 = vector.shape_cast %156 : vector<2x8x32xf32> to vector<16x32xf32>
      %162 = vector.extract_strided_slice %4 {offsets = [10, 0], sizes = [1, 32], strides = [1, 1]} : vector<12x32xf32> to vector<1x32xf32>
      %163 = vector.shape_cast %162 : vector<1x32xf32> to vector<32xf32>
      %164 = vector.extract_strided_slice %4 {offsets = [11, 0], sizes = [1, 32], strides = [1, 1]} : vector<12x32xf32> to vector<1x32xf32>
      %165 = vector.shape_cast %164 : vector<1x32xf32> to vector<32xf32>
      %cst_50 = arith.constant dense<0.000000e+00> : vector<16xf32>
      %166 = vector.multi_reduction <add>, %161, %cst_50 [1] : vector<16x32xf32> to vector<16xf32>
      %167 = vector.shape_cast %166 : vector<16xf32> to vector<16x1xf32>
      %cst_51 = arith.constant 3.200000e+01 : f32
      %168 = vector.broadcast %cst_51 : f32 to vector<16x1xf32>
      %169 = arith.divf %167, %168 : vector<16x1xf32>
      %170 = arith.mulf %161, %161 : vector<16x32xf32>
      %cst_52 = arith.constant dense<0.000000e+00> : vector<16xf32>
      %171 = vector.multi_reduction <add>, %170, %cst_52 [1] : vector<16x32xf32> to vector<16xf32>
      %172 = vector.shape_cast %171 : vector<16xf32> to vector<16x1xf32>
      %cst_53 = arith.constant 3.200000e+01 : f32
      %173 = vector.broadcast %cst_53 : f32 to vector<16x1xf32>
      %174 = arith.divf %172, %173 : vector<16x1xf32>
      %175 = arith.mulf %169, %169 : vector<16x1xf32>
      %176 = arith.subf %174, %175 : vector<16x1xf32>
      %cst_54 = arith.constant 0.000000e+00 : f32
      %177 = vector.broadcast %cst_54 : f32 to vector<16x1xf32>
      %178 = arith.maximumf %176, %177 : vector<16x1xf32>
      %179 = vector.broadcast %169 : vector<16x1xf32> to vector<16x32xf32>
      %180 = arith.subf %161, %179 : vector<16x32xf32>
      %cst_55 = arith.constant 9.99999993E-9 : f32
      %181 = vector.broadcast %cst_55 : f32 to vector<16x1xf32>
      %182 = arith.addf %178, %181 : vector<16x1xf32>
      %183 = math.rsqrt %182 : vector<16x1xf32>
      %184 = vector.broadcast %183 : vector<16x1xf32> to vector<16x32xf32>
      %185 = arith.mulf %180, %184 : vector<16x32xf32>
      %186 = vector.shape_cast %163 : vector<32xf32> to vector<1x32xf32>
      %187 = vector.broadcast %186 : vector<1x32xf32> to vector<16x32xf32>
      %188 = arith.mulf %185, %187 : vector<16x32xf32>
      %189 = vector.shape_cast %165 : vector<32xf32> to vector<1x32xf32>
      %190 = vector.broadcast %189 : vector<1x32xf32> to vector<16x32xf32>
      %191 = arith.addf %188, %190 : vector<16x32xf32>
      %192 = vector.shape_cast %191 : vector<16x32xf32> to vector<2x8x32xf32>
      %c0_56 = arith.constant 0 : index
      %c0_57 = arith.constant 0 : index
      %c0_58 = arith.constant 0 : index
      %193 = vector.load %arg10[%c0_56, %c0_57, %c0_58] : memref<2x8x32xf32, #tpu.memory_space<vmem>>, vector<2x8x32xf32>
      tpu.vector_store %arg10[%c0_56, %c0_57, %c0_58], %192 {strides = array<i32>} : memref<2x8x32xf32, #tpu.memory_space<vmem>>, vector<2x8x32xf32>,
    } else {
    }
    return
  }
  func.func @transform_0(%arg0: i32, %arg1: i32) -> (i32, i32, i32) {
    %c0_i32 = arith.constant 0 : i32
    %c0_i32_0 = arith.constant 0 : i32
    %c0_i32_1 = arith.constant 0 : i32
    return %arg0, %c0_i32, %c0_i32_0 : i32, i32, i32
  }
  func.func @transform_1(%arg0: i32, %arg1: i32) -> (i32, i32, i32) {
    %c0_i32 = arith.constant 0 : i32
    %c0_i32_0 = arith.constant 0 : i32
    %c0_i32_1 = arith.constant 0 : i32
    return %arg0, %c0_i32, %c0_i32_0 : i32, i32, i32
  }
  func.func @transform_2(%arg0: i32, %arg1: i32) -> (i32, i32, i32) {
    %c0_i32 = arith.constant 0 : i32
    %c0_i32_0 = arith.constant 0 : i32
    %c0_i32_1 = arith.constant 0 : i32
    return %arg1, %c0_i32, %c0_i32_0 : i32, i32, i32
  }
  func.func @transform_3(%arg0: i32, %arg1: i32) -> (i32, i32, i32) {
    %c0_i32 = arith.constant 0 : i32
    %c0_i32_0 = arith.constant 0 : i32
    %c0_i32_1 = arith.constant 0 : i32
    return %arg1, %c0_i32, %c0_i32_0 : i32, i32, i32
  }
  func.func @transform_4(%arg0: i32, %arg1: i32) -> (i32, i32, i32) {
    %c0_i32 = arith.constant 0 : i32
    %c0_i32_0 = arith.constant 0 : i32
    %c0_i32_1 = arith.constant 0 : i32
    return %arg1, %c0_i32, %c0_i32_0 : i32, i32, i32
  }
  func.func @transform_5(%arg0: i32, %arg1: i32) -> (i32, i32, i32) {
    %c0_i32 = arith.constant 0 : i32
    %c0_i32_0 = arith.constant 0 : i32
    %c0_i32_1 = arith.constant 0 : i32
    return %arg1, %c0_i32, %c0_i32_0 : i32, i32, i32
  }
  func.func @transform_6(%arg0: i32, %arg1: i32) -> (i32, i32, i32) {
    %c0_i32 = arith.constant 0 : i32
    %c0_i32_0 = arith.constant 0 : i32
    %c0_i32_1 = arith.constant 0 : i32
    return %arg1, %c0_i32, %c0_i32_0 : i32, i32, i32
  }
  func.func @transform_7(%arg0: i32, %arg1: i32) -> (i32, i32, i32) {
    %c0_i32 = arith.constant 0 : i32
    %c0_i32_0 = arith.constant 0 : i32
    %c0_i32_1 = arith.constant 0 : i32
    return %arg1, %c0_i32, %c0_i32_0 : i32, i32, i32
  }
  func.func @transform_8(%arg0: i32, %arg1: i32) -> (i32, i32, i32) {
    %c0_i32 = arith.constant 0 : i32
    %c0_i32_0 = arith.constant 0 : i32
    %c0_i32_1 = arith.constant 0 : i32
    return %arg0, %c0_i32, %c0_i32_0 : i32, i32, i32
  }
}

</mosaic_0001>

<bundles_post_ra>
// kernel: tpu_custom_call.1
= control target key start
LH: loop header
LB: loop body
LE: loop exit
PB: predicated region body
PF: predicated region fallthrough
CT: control target
= control target key end

     0   :  { %s3858_s0 = inlined_call_operand.hbm [shape: f32[2,8,32], index: 0, kind: input, shape index: {}]   ;;  %s3859_s1 = inlined_call_operand.vmem [shape: f32[2,8,1], index: 1, kind: input, shape index: {}]   ;;  %s3860_s2 = inlined_call_operand.vmem [shape: bf16[2,32,32], index: 2, kind: input, shape index: {}]   ;;  %s3861_s3 = inlined_call_operand.vmem [shape: bf16[2,32,64], index: 3, kind: input, shape index: {}]   ;;  %s3862_s4 = inlined_call_operand.hbm [shape: bf16[2,32,32], index: 4, kind: input, shape index: {}]   ;;  %s3863_s5 = inlined_call_operand.hbm [shape: bf16[2,32,32], index: 5, kind: input, shape index: {}]   ;;  %s3864_s6 = inlined_call_operand.hbm [shape: bf16[2,32,32], index: 6, kind: input, shape index: {}]   ;;  %s3865_s7 = inlined_call_operand.vmem [shape: f32[2,12,32], index: 7, kind: input, shape index: {}]   ;;  %s3866_s8 = inlined_call_operand.hbm [shape: f32[2,8,32], index: 8, kind: output, shape index: {}]  }
   0x1   :  { %3875 = sst [smem:[#allocation20_spill]] %s3858_s0 }
   0x2   :  { %3876 = sst [smem:[#allocation21_spill]] %s3862_s4 }
   0x3   :  { %3877 = sst [smem:[#allocation22_spill]] %s3863_s5 }
   0x4   :  { %3878 = sst [smem:[#allocation23_spill]] %s3866_s8 }
   0x5   :  { %13 = vsyncpa [#allocation4], 0 }
   0x6   :  { %14 = vsyncpa [#allocation7], 0 }
   0x7   :  { %16 = vsyncpa [#allocation7 + $0x1], 0 }
   0x8   :  { %17 = vsyncpa [#allocation10], 0 }
   0x9   :  { %19 = vsyncpa [#allocation10 + $0x1], 0 }
   0xa   :  { %20 = vsyncpa [#allocation5], 0  ;;  %s3144_s27 = smov 0   ;;  %s3146_s28 = smov 0  }
   0xb   :  { %s3148_s29 = smov 0   ;;  %s3150_s30 = smov 0  }
   0xc   :  { %s3152_s9 = smov 0   ;;  %s3154_s10 = smov 0  }
   0xd LB: > { %3879 = sst [smem:[#allocation16_spill]] %s3074_s9  ;;  %s35_s11 = sadd.s32 1, %s3074_s9  ;;  %s3078_s10 = sphi %s3154_s10, %s26_s10   ;;  %s3074_s9 = sphi %s3152_s9, %s3897_s9   ;;  %s3070_s30 = sphi %s3150_s30, %s3896_s30   ;;  %s3066_s29 = sphi %s3148_s29, %s3900_s29   ;;  %s3062_s28 = sphi %s3146_s28, %s3899_s28   ;;  %s3058_s27 = sphi %s3144_s27, %s3898_s27  }
   0xe   : > { %3880 = sst [smem:[#allocation17_spill]] %s3078_s10  ;;  %s149_s12 = sadd.s32 1, %s3066_s29 }
   0xf   : > { %p36_p0 = scmp.ge.s32.totalorder %s35_s11, 2  ;;  %p156_p1 = scmp.ne.s32.totalorder %s3066_s29, %s3062_s28 }
  0x10   : > { %p157_p2 = scmp.eq.s32.totalorder %s3078_s10, 0  ;;  %p2668_p4 = scmp.lt.s32.totalorder %s3078_s10, 2 }
  0x11   : > { %s3902_s11 = smov (%p36_p0, %s35_s11), 0  ;;  %s332_s15 = sand.u32 1, %s3078_s10  }
  0x12   : > { %3881 = sst [smem:[#allocation18_spill]] %s3902_s11  ;;  %p3181_p3 = por %p157_p2, %p156_p1 }
  0x13   : > { %s146_s14 = ssub.s32 %s3074_s9, %s3902_s11  ;;  %s3867_s16 = sand.u32 1, %s3066_s29  }
  0x14   : > { %p147_p5 = scmp.eq.s32.totalorder %s146_s14, 0  ;;  %s3191_s17 = sshll.u32 %s3074_s9, 4 }
  0x15   : > { %s3198_s19 = sshll.u32 %s3867_s16, 4  ;;  %s3884_s4 = sld [smem:[#allocation21_spill]] }
  0x16   : > { %s3194_s18 = scalar_select %p147_p5, %s3066_s29, %s149_s12  }
  0x17   : > { %s336_s24 = scalar_lea.vmem [#allocation6], %s3198_s19  ;;  %p3209_p6 = pnand %p2668_p4, %p3181_p3 }
  0x18   : > { %3883 = sst [smem:[#allocation19_spill]] %s3194_s18  ;;  %s344_s25 = sshll.u32 %s336_s24, 4  ;;  %s345_s25 = int_to_ptr.vmem [resolvable:$true] %s344_s25 }
  0x19   : > { %s3213_s12 = scalar_lea.sflag [#allocation7], %s332_s15  ;;  %s3868_s14 = smov 64  }
  0x1a   : > { %s3870_s20 = smov 4   ;;  %s3222_s21 = sadd.s32 4294967295, %s3078_s10  }
  0x1b   : > { %s341_s22 = scalar_lea.hbm %s3884_s4, %s3191_s17  ;;  %p162_p7 = scmp.ne.s32.totalorder %s3062_s28, %s3058_s27 }
  0x1c   : > { %s342_s23 = sshll.u32 %s341_s22, 4  ;;  %p163_p8 = scmp.eq.s32.totalorder %s3222_s21, 0  ;;  %s343_s23 = int_to_ptr.hbm [resolvable:$true] %s342_s23 }
  0x1d   : > { %2660 = dma.hbm_to_vmem [thread:$0]  (!%p3209_p6), %s343_s23, 256, %s345_s25, %s3213_s12, %s3868_s14, %s3868_s14, %s3870_s20  }
  0x1e   : > { %p2532_p9 = scmp.ge.s32.totalorder %s3078_s10, 1  ;;  %p277_p10 = scmp.lt.s32.totalorder %s3078_s10, 3 }
  0x1f   : > { %p3231_p11 = por %p163_p8, %p162_p7  ;;  %s3888_s0 = sld [smem:[#allocation20_spill]] }
  0x20   : > { %p3235_p12 = pnand %p2532_p9, %p277_p10  ;;  %s3082_s27 = smov [#allocation3]  }
  0x21   : > { %s293_s25 = sshll.u32 %s3082_s27, 4  ;;  %s3889_s5 = sld [smem:[#allocation22_spill]]  ;;  %s294_s25 = int_to_ptr.vmem [resolvable:$true] %s293_s25 }
  0x22   : > { %p2653_p13 = pneg %p3235_p12  ;;  %s3083_s23 = smov 128  }
  0x23   : > { %s358_s4 = scalar_lea.vmem [#allocation8], %s3198_s19  ;;  %s3890_s9 = smov 4  }
  0x24   : > { %p2654_p0 = pnand %p2653_p13, %p163_p8  ;;  %s366_s11 = sshll.u32 %s358_s4, 4  ;;  %s367_s11 = int_to_ptr.vmem [resolvable:$true] %s366_s11 }
  0x25   : > { %s291_s24 = sshll.u32 %s3888_s0, 4  ;;  %s3084_s0 = smov 8   ;;  %s292_s24 = int_to_ptr.hbm [resolvable:$true] %s291_s24 }
  0x26   : > { %2656 = dma.hbm_to_vmem [thread:$0]  (!%p2654_p0), %s292_s24, 256, %s294_s25, [#allocation4], %s3083_s23, %s3083_s23, %s3084_s0  }
  0x27   : > { %s363_s20 = scalar_lea.hbm %s3889_s5, %s3191_s17  ;;  %s3891_s27 = smov 64  }
  0x28   : > { %s364_s22 = sshll.u32 %s363_s20, 4  ;;  %s385_s16 = scalar_lea.hbm %s3864_s6, %s3191_s17  ;;  %s365_s22 = int_to_ptr.hbm [resolvable:$true] %s364_s22 }
  0x29   : > { %2663 = dma.hbm_to_vmem [thread:$0]  (!%p3209_p6), %s365_s22, 256, %s367_s11, %s3213_s12, %s3891_s27, %s3891_s27, %s3890_s9  }
  0x2a   : > { %s386_s14 = sshll.u32 %s385_s16, 4  ;;  %s380_s5 = scalar_lea.vmem [#allocation9], %s3198_s19  ;;  %s387_s14 = int_to_ptr.hbm [resolvable:$true] %s386_s14 }
  0x2b   : > { %s388_s20 = sshll.u32 %s380_s5, 4  ;;  %s3892_s8 = sand.u32 1, %s3066_s29   ;;  %s389_s20 = int_to_ptr.vmem [resolvable:$true] %s388_s20 }
  0x2c   : > { %s377_s0 = scalar_lea.sflag [#allocation10], %s3892_s8  ;;  %408 = sbr.rel (%p3235_p12) target bundleno = 1967 (0x7af), region = 52 }
  0x2d   : > { %2666 = dma.hbm_to_vmem [thread:$0]  (!%p3209_p6), %s387_s14, 256, %s389_s20, %s377_s0, %s3891_s27, %s3891_s27, %s3890_s9  }
  0x31   : > { %3041 = dma.done.wait (%p163_p8), [#allocation4], 256  }
  0x32   : > { %3043 = vsyncadd (%p163_p8), [#allocation4], 4294967040  ;;  %s415_s4 = sand.u32 1, %s3222_s21   ;;  %s417_s5 = sand.u32 1, %s3062_s28  }
  0x33   : > { %s3277_s8 = sshll.u32 %s417_s5, 4  ;;  %s416_s10 = scalar_lea.sflag [#allocation7], %s415_s4 }
  0x34   : > { %s419_s11 = scalar_lea.vmem [#allocation6], %s3277_s8 }
  0x35   : > { %3045 = dma.done.wait (%p3231_p11), %s416_s10, 512  }
  0x36   : > { %3047 = vsyncadd (%p3231_p11), %s416_s10, 4294966784  ;;  %s429_s9 = scalar_lea.vmem [#allocation8], %s3277_s8  ;;  %s436_s17 = scalar_lea.sflag [#allocation10], %s417_s5 }
  0x37   : > { %s439_s18 = scalar_lea.vmem [#allocation9], %s3277_s8 }
  0x38   : > { %3049 = dma.done.wait (%p3231_p11), %s436_s17, 256  }
  0x39   : > { %3051 = vsyncadd (%p3231_p11), %s436_s17, 4294967040  ;;  %p505_p1 = scmp.lt.s32.totalorder %s3070_s30, 1  ;;  %p2556_p2 = scmp.ne.s32.totalorder %s3070_s30, 0 }
  0x3b   : > { %s506_s19 = scalar_select %p505_p1, %s3070_s30, 1 }
  0x3c   : > { %525 = sbr.rel (%p2556_p2) target bundleno = 68 (0x44), region = 72 }
  0x3d   : > { %s2626_s26 = sshll.u32 %s506_s19, 4 }
  0x3e   : > { %s3295_s24 = scalar_lea.vmem %s3860_s2, %s2626_s26  ;;  %s514_s23 = scalar_lea.vmem %s3861_s3, %s2626_s26 }
  0x3f   : > { %s3303_s14 = scalar_lea.vmem %s3865_s7, %s2626_s26 }
  0x41   : > { %v526_v0 = vld [vmem:[#allocation3] sm:$0xff]  ;;  %vm528_vm0 = vcmask 261120   ;;  %v527_v1 = vld [vmem:[#allocation3 + $0x8] sm:$0xff] }
  0x42   : > { %529 = vst.msk [vmem:[#allocation2] sm:$0xff] %vm528_vm0, %v526_v0 }
  0x43   : > { %530 = vst.msk [vmem:[#allocation2 + $0x8] sm:$0xff] %vm528_vm0, %v527_v1 }
  0x44 PF: > { %vm535_vm1 = vcmask 261120   ;;  %v2632_v3 = vld [vmem:[%s514_s23 + $0x8] sm:$0xff]  ;;  %v2631_v7 = vld [vmem:[%s514_s23] sm:$0xff]  ;;  %v3085_v13 = vmov 32.0   ;;  %s3086_s13 = smov 104   ;;  %s3087_s20 = smov 120  }
  0x45   : > { %660 = vmatpush.bf16.msra.mxu1 %v2632_v3  ;;  %2821 = vrcp.f32 %v3085_v13  ;;  %v2630_v25 = vld [vmem:[%s3295_s24 + $0x8] sm:$0xff]  ;;  %v2629_v27 = vld [vmem:[%s3295_s24] sm:$0xff]  ;;  %s3088_s0 = smov 112   ;;  %vm699_vm9 = vcmask 1047556   ;;  %vm1441_vm10 = vcmask 64512   ;;  %s3091_s4 = smov 32  }
  0x46   : > { %626 = vmatpush.bf16.msra.mxu0 %v2630_v25  ;;  %v3334_v41 = vld [vmem:[%s3303_s14] sm:$0xff]  ;;  %s3092_s5 = smov 96   ;;  %vm1701_vm11 = vcmask 1043456   ;;  %s3093_s10 = smov 16   ;;  %vm2097_vm12 = vcmask 130048   ;;  %vm2100_vm13 = vcmask 195584  }
  0x47   : > { %v668_v43 = vperm.slane %v3334_v41, 3  ;;  %v593_v59 = vperm.slane %v3334_v41, 0  ;;  %v596_v1 = vperm.slane %v3334_v41, 1  ;;  %s3094_s17 = smov 24   ;;  %s3095_s19 = smov 8  }
  0x48   : > { %p2618_p3 = scmp.ne.s32.totalorder %s3070_s30, 1 }
  0x49   : > { %v3306_v2 = vld [vmem:[#allocation2] sm:$0xff]  ;;  %661 = vmatpush.bf16.msra.mxu1 %v2631_v7 }
  0x4a   : > { %v536_v4 = vsel %vm535_vm1, %v3306_v2, 0.0  ;;  %v551_v5 = vmul.f32 %v3306_v2, %v3306_v2  ;;  %v3312_v6 = vld [vmem:[#allocation2 + $0x8] sm:$0xff]  ;;  %627 = vmatpush.bf16.msra.mxu0 %v2629_v27 }
  0x4b   : > { %537 = vadd.xlane.f32.xlu0 %v536_v4  ;;  %v552_v9 = vmul.f32 %v3312_v6, %v3312_v6  ;;  %v634_v10 = vpack.c.bf16 %v3312_v6, %v3306_v2  ;;  %v539_v11 = vsel %vm535_vm1, %v3312_v6, 0.0  ;;  %v2822_v14 = vpop.eup %2821 }
  0x4c   : > { %v553_v8 = vsel %vm535_vm1, %v551_v5, 0.0  ;;  %v543_v15 = vmul.f32 32.0, %v2822_v14  ;;  %vm547_vm2 = vweird.f32 %v2822_v14 }
  0x4d   : > { %554 = vadd.xlane.f32.xlu1 %v553_v8  ;;  %v556_v12 = vsel %vm535_vm1, %v552_v9, 0.0  ;;  %2574 = vmatmul.msk.bf16.vlgmr.msra.gmra.mxu1 %vm535_vm1, %v634_v10  ;;  %v3089_v9 = vmov 1983009808  }
  0x4e   : > { %v544_v16 = vsub.f32 1.0, %v543_v15  ;;  %v704_v10 = vunpack.c.l.s4 %v3089_v9 }
  0x50   : > { %v545_v17 = vmul.f32 %v2822_v14, %v544_v16  ;;  %v3355_v15 = vunpack.c.0.s8 %v704_v10 }
  0x52   : > { %v546_v18 = vadd.f32 %v2822_v14, %v545_v17 }
  0x53   : > { %540 = vadd.xlane.f32.xlu0 %v539_v11 }
  0x54   : > { %v3323_v19 = vsel %vm547_vm2, %v2822_v14, %v546_v18 }
  0x55   : > { %557 = vadd.xlane.f32.xlu1 %v556_v12 }
  0xbe   : > { %v538_v20 = vpop.xlane.xlu0 %537 }
  0xbf   : > { %v549_v21 = vmul.f32 %v3323_v19, %v538_v20 }
  0xc0   : > { %v555_v22 = vpop.xlane.xlu1 %554 }
  0xc1   : > { %v561_v23 = vmul.f32 %v549_v21, %v549_v21  ;;  %v559_v24 = vmul.f32 %v555_v22, %v3323_v19  ;;  %v567_v56 = vsub.f32 %v3306_v2, %v549_v21 }
  0xc3   : > { %v563_v26 = vsub.f32 %v559_v24, %v561_v23 }
  0xc5   : > { %v565_v28 = vmax.f32 %v563_v26, 0.0  ;;  %v3090_v26 = vmov 1934713408  }
  0xc6   : > { %v541_v29 = vpop.xlane.xlu0 %540  ;;  %v728_v27 = vunpack.c.l.s4 %v3090_v26 }
  0xc7   : > { %v569_v30 = vadd.f32 1e-08, %v565_v28  ;;  %v550_v31 = vmul.f32 %v3323_v19, %v541_v29 }
  0xc8   : > { %v558_v32 = vpop.xlane.xlu1 %557 }
  0xc9   : > { %2823 = vrsqrt.f32 %v569_v30  ;;  %v562_v33 = vmul.f32 %v550_v31, %v550_v31  ;;  %v560_v34 = vmul.f32 %v558_v32, %v3323_v19  ;;  %vm577_vm4 = vweird.f32 %v569_v30 }
  0xca   : > { %v3331_v38 = vpop.f32.mrf.mxu1  ;;  %v568_v61 = vsub.f32 %v3312_v6, %v550_v31 }
  0xcb   : > { %v564_v35 = vsub.f32 %v560_v34, %v562_v33  ;;  %v669_v46 = vadd.f32 %v668_v43, %v3331_v38 }
  0xcd   : > { %v566_v36 = vmax.f32 %v564_v35, 0.0  ;;  %v949_v13 = vrot.slane %v669_v46, 4 }
  0xcf   : > { %v2824_v37 = vpop.eup %2823  ;;  %v570_v40 = vadd.f32 1e-08, %v566_v36 }
  0xd0   : > { %v572_v39 = vmul.f32 %v2824_v37, %v569_v30  ;;  %vm578_vm3 = vweird.f32 %v2824_v37 }
  0xd1   : > { %2825 = vrsqrt.f32 %v570_v40  ;;  %vm579_vm5 = vmor %vm577_vm4, %vm578_vm3  ;;  %vm587_vm7 = vweird.f32 %v570_v40 }
  0xd2   : > { %v573_v42 = vmul.f32 %v2824_v37, %v572_v39  ;;  %v3338_v47 = vpop.f32.mrf.mxu1 }
  0xd3   : > { %v670_v49 = vadd.f32 %v668_v43, %v3338_v47 }
  0xd4   : > { %v574_v44 = vmul.f32 0.5, %v573_v42 }
  0xd5   : > { %v2749_v52 = vpack.i.bf16 %v670_v49, %v669_v46  ;;  %v1005_v12 = vrot.slane %v670_v49, 4 }
  0xd6   : > { %v575_v45 = vsub.f32 1.5, %v574_v44 }
  0xd7   : > { %v2826_v48 = vpop.eup %2825  ;;  %2750 = vrot.lane.b32.xlu0 %v2749_v52, %s3086_s13  ;;  %2740 = vrot.lane.b32.xlu2 %v2749_v52, %s3087_s20 }
  0xd8   : > { %v576_v50 = vmul.f32 %v2824_v37, %v575_v45  ;;  %v582_v51 = vmul.f32 %v2826_v48, %v570_v40  ;;  %vm588_vm6 = vweird.f32 %v2826_v48 }
  0xd9   : > { %vm589_vm8 = vmor %vm587_vm7, %vm588_vm6 }
  0xda   : > { %v583_v53 = vmul.f32 %v2826_v48, %v582_v51  ;;  %v580_v55 = vsel %vm579_vm5, %v2824_v37, %v576_v50  ;;  %v3365_v37 = vunpack.c.0.s8 %v728_v27 }
  0xdb   : > { %v591_v58 = vmul.f32 %v580_v55, %v567_v56 }
  0xdc   : > { %v584_v54 = vmul.f32 0.5, %v583_v53 }
  0xdd   : > { %v594_v0 = vmul.f32 %v593_v59, %v591_v58 }
  0xde   : > { %v585_v57 = vsub.f32 1.5, %v584_v54 }
  0xdf   : > { %2745 = vrot.lane.b32.xlu2 %v2749_v52, %s3088_s0  ;;  %v3348_v2 = vadd.f32 %v596_v1, %v594_v0 }
  0xe0   : > { %v586_v60 = vmul.f32 %v2826_v48, %v585_v57 }
  0xe2   : > { %v590_v62 = vsel %vm589_vm8, %v2826_v48, %v586_v60 }
  0xe3   : > { %v592_v63 = vmul.f32 %v590_v62, %v568_v61 }
  0xe5   : > { %v595_v3 = vmul.f32 %v593_v59, %v592_v63 }
  0xe7   : > { %v3350_v4 = vadd.f32 %v596_v1, %v595_v3 }
  0xe9   : > { %v599_v5 = vpack.c.bf16 %v3350_v4, %v3348_v2 }
  0xeb   : > { %2565 = vmatmul.msk.bf16.vlgmr.msra.gmra.mxu0 %vm535_vm1, %v599_v5 }
 0x131   : > { %v2741_v6 = vpop.permute.xlu2 %2740 }
 0x132   : > { %v2743_v17 = vunpack.i.h.bf16 %v2741_v6  ;;  %v2742_v18 = vunpack.i.l.bf16 %v2741_v6 }
 0x134   : > { %v1017_v28 = vrot.slane %v2743_v17, 4  ;;  %v961_v29 = vrot.slane %v2742_v18, 4 }
 0x139   : > { %v2746_v7 = vpop.permute.xlu2 %2745 }
 0x13a   : > { %v2747_v8 = vunpack.i.l.bf16 %v2746_v7  ;;  %v2748_v11 = vunpack.i.h.bf16 %v2746_v7 }
 0x13c   : > { %v947_v14 = vrot.slane %v2747_v8, 4  ;;  %v1003_v16 = vrot.slane %v2748_v11, 4  ;;  %v1006_v20 = vsel %vm699_vm9, %v2748_v11, %v1005_v12  ;;  %v950_v21 = vsel %vm699_vm9, %v2747_v8, %v949_v13 }
 0x13d   : > { %v1014_v24 = vperm.slane %v1006_v20, %v3355_v15  ;;  %v958_v25 = vperm.slane %v950_v21, %v3355_v15 }
 0x13e   : > { %v948_v22 = vsel %vm699_vm9, %v947_v14, %v669_v46  ;;  %v1004_v23 = vsel %vm699_vm9, %v1003_v16, %v670_v49 }
 0x13f   : > { %v954_v30 = vperm.slane %v948_v22, %v3355_v15  ;;  %v1010_v32 = vperm.slane %v1004_v23, %v3355_v15  ;;  %v1041_v35 = vrot.slane %v1014_v24, 4  ;;  %v985_v36 = vrot.slane %v958_v25, 4 }
 0x141   : > { %v973_v44 = vrot.slane %v954_v30, 4  ;;  %v1029_v48 = vrot.slane %v1010_v32, 4 }
 0x149   : > { %v2751_v31 = vpop.permute.xlu0 %2750 }
 0x14a   : > { %v2753_v33 = vunpack.i.h.bf16 %v2751_v31  ;;  %v2752_v34 = vunpack.i.l.bf16 %v2751_v31 }
 0x14c   : > { %v1015_v39 = vrot.slane %v2753_v33, 4  ;;  %v959_v40 = vrot.slane %v2752_v34, 4  ;;  %v962_v42 = vsel %vm699_vm9, %v2752_v34, %v961_v29  ;;  %v1018_v43 = vsel %vm699_vm9, %v2753_v33, %v1017_v28 }
 0x14d   : > { %v970_v45 = vperm.slane %v962_v42, %v3355_v15  ;;  %v1026_v46 = vperm.slane %v1018_v43, %v3355_v15 }
 0x14e   : > { %v960_v49 = vsel %vm699_vm9, %v959_v40, %v2742_v18  ;;  %v1016_v50 = vsel %vm699_vm9, %v1015_v39, %v2743_v17 }
 0x14f   : > { %v966_v51 = vperm.slane %v960_v49, %v3355_v15  ;;  %v983_v52 = vrot.slane %v970_v45, 4  ;;  %v986_v53 = vsel %vm699_vm9, %v970_v45, %v985_v36  ;;  %v1022_v54 = vperm.slane %v1016_v50, %v3355_v15 }
 0x150   : > { %v994_v55 = vperm.slane %v986_v53, %v3365_v37  ;;  %v1039_v56 = vrot.slane %v1026_v46, 4  ;;  %v1042_v57 = vsel %vm699_vm9, %v1026_v46, %v1041_v35 }
 0x151   : > { %v971_v58 = vrot.slane %v966_v51, 4  ;;  %v974_v59 = vsel %vm699_vm9, %v966_v51, %v973_v44  ;;  %v984_v60 = vsel %vm699_vm9, %v983_v52, %v958_v25  ;;  %v1027_v61 = vrot.slane %v1022_v54, 4 }
 0x152   : > { %v982_v62 = vperm.slane %v974_v59, %v3365_v37  ;;  %v990_v63 = vperm.slane %v984_v60, %v3365_v37  ;;  %v1001_v0 = vrot.slane %v994_v55, 4  ;;  %v1030_v1 = vsel %vm699_vm9, %v1022_v54, %v1029_v48 }
 0x153   : > { %v972_v3 = vsel %vm699_vm9, %v971_v58, %v954_v30  ;;  %v1028_v5 = vsel %vm699_vm9, %v1027_v61, %v1010_v32  ;;  %v1038_v6 = vperm.slane %v1030_v1, %v3365_v37  ;;  %v1040_v7 = vsel %vm699_vm9, %v1039_v56, %v1014_v24 }
 0x154   : > { %v978_v8 = vperm.slane %v972_v3, %v3365_v37  ;;  %v997_v9 = vrot.slane %v982_v62, 4  ;;  %v999_v10 = vrot.slane %v990_v63, 4  ;;  %v1002_v11 = vsel %vm699_vm9, 0.0, %v1001_v0 }
 0x155   : > { %v1034_v12 = vperm.slane %v1028_v5, %v3365_v37  ;;  %v1046_v13 = vperm.slane %v1040_v7, %v3365_v37  ;;  %v1050_v14 = vperm.slane %v1042_v57, %v3365_v37  ;;  %v1053_v16 = vrot.slane %v1038_v6, 4 }
 0x156   : > { %v995_v17 = vrot.slane %v978_v8, 4  ;;  %v998_v18 = vsel %vm699_vm9, 0.0, %v997_v9  ;;  %v1000_v20 = vsel %vm699_vm9, 0.0, %v999_v10  ;;  %v1075_v21 = vrot.slane %v1002_v11, 4 }
 0x157   : > { %v1051_v22 = vrot.slane %v1034_v12, 4  ;;  %v1054_v23 = vsel %vm699_vm9, 0.0, %v1053_v16  ;;  %v1055_v24 = vrot.slane %v1046_v13, 4  ;;  %v1057_v25 = vrot.slane %v1050_v14, 4 }
 0x158   : > { %v1064_v26 = vrot.slane %v998_v18, 4  ;;  %v1118_v27 = vrot.slane %v1054_v23, 4  ;;  %v996_v28 = vsel %vm699_vm9, 0.0, %v995_v17  ;;  %v1059_v29 = vsel %vm699_vm9, %v997_v9, %v978_v8 }
 0x159   : > { %v1056_v30 = vsel %vm699_vm9, 0.0, %v1055_v24  ;;  %v1058_v31 = vsel %vm699_vm9, 0.0, %v1057_v25  ;;  %v1063_v32 = vperm.slane %v1059_v29, %v3355_v15  ;;  %v1070_v33 = vsel %vm699_vm9, %v1001_v0, %v990_v63 }
 0x15a   : > { %v1129_v34 = vrot.slane %v1058_v31, 4  ;;  %v1065_v35 = vsel %vm699_vm9, %v1064_v26, %v996_v28  ;;  %v1074_v36 = vperm.slane %v1070_v33, %v3355_v15  ;;  %v1076_v39 = vsel %vm699_vm9, %v1075_v21, %v1000_v20 }
 0x15b   : > { %v1069_v40 = vperm.slane %v1065_v35, %v3355_v15  ;;  %v1080_v42 = vperm.slane %v1076_v39, %v3355_v15  ;;  %v1052_v43 = vsel %vm699_vm9, 0.0, %v1051_v22  ;;  %v1113_v44 = vsel %vm699_vm9, %v1053_v16, %v1034_v12 }
 0x15c   : > { %v1117_v45 = vperm.slane %v1113_v44, %v3355_v15  ;;  %v1119_v46 = vsel %vm699_vm9, %v1118_v27, %v1052_v43  ;;  %v1124_v48 = vsel %vm699_vm9, %v1057_v25, %v1046_v13  ;;  %v1130_v49 = vsel %vm699_vm9, %v1129_v34, %v1056_v30 }
 0x15d   : > { %v1081_v50 = vrot.slane %v1069_v40, 4  ;;  %v1093_v51 = vrot.slane %v1080_v42, 4  ;;  %v1123_v52 = vperm.slane %v1119_v46, %v3355_v15  ;;  %v1128_v53 = vperm.slane %v1124_v48, %v3355_v15 }
 0x15e   : > { %v1134_v54 = vperm.slane %v1130_v49, %v3355_v15  ;;  %v1083_v55 = vrot.slane %v1063_v32, 4  ;;  %v1095_v56 = vrot.slane %v1074_v36, 4  ;;  %v1137_v57 = vrot.slane %v1117_v45, 4 }
 0x15f   : > { %v1082_v58 = vsel %vm699_vm9, %v1081_v50, %v1063_v32  ;;  %v1094_v59 = vsel %vm699_vm9, %v1093_v51, %v1074_v36  ;;  %v1135_v60 = vrot.slane %v1123_v52, 4  ;;  %v1149_v61 = vrot.slane %v1128_v53, 4 }
 0x160   : > { %v1088_v62 = vperm.slane %v1082_v58, %v3365_v37  ;;  %v1100_v63 = vperm.slane %v1094_v59, %v3365_v37  ;;  %v1147_v0 = vrot.slane %v1134_v54, 4  ;;  %v1084_v1 = vsel %vm699_vm9, %v1069_v40, %v1083_v55 }
 0x161   : > { %v1136_v3 = vsel %vm699_vm9, %v1135_v60, %v1117_v45  ;;  %v1092_v5 = vperm.slane %v1084_v1, %v3365_v37  ;;  %v1096_v6 = vsel %vm699_vm9, %v1080_v42, %v1095_v56  ;;  %v1138_v7 = vsel %vm699_vm9, %v1123_v52, %v1137_v57 }
 0x162   : > { %v1105_v8 = vrot.slane %v1100_v63, 4  ;;  %v1142_v9 = vperm.slane %v1136_v3, %v3365_v37  ;;  %v1148_v10 = vsel %vm699_vm9, %v1147_v0, %v1128_v53  ;;  %v1107_v11 = vrot.slane %v1088_v62, 4 }
 0x163   : > { %v1154_v12 = vperm.slane %v1148_v10, %v3365_v37  ;;  %v1104_v13 = vperm.slane %v1096_v6, %v3365_v37  ;;  %v1111_v14 = vrot.slane %v1092_v5, 4  ;;  %v1146_v16 = vperm.slane %v1138_v7, %v3365_v37 }
 0x164   : > { %v1106_v18 = vsel %vm699_vm9, %v1105_v8, %v1088_v62  ;;  %v1108_v20 = vsel %vm699_vm9, %v1100_v63, %v1107_v11  ;;  %v1161_v21 = vrot.slane %v1142_v9, 4  ;;  %v1150_v22 = vsel %vm699_vm9, %v1134_v54, %v1149_v61 }
 0x165   : > { %v604_v23 = vperm.slane %v3334_v41, 2  ;;  %v1167_v24 = vpack.c.bf16 %v1106_v18, %v1106_v18  ;;  %v1159_v25 = vrot.slane %v1154_v12, 4  ;;  %v1169_v26 = vpack.c.bf16 %v1108_v20, %v1108_v20 }
 0x166   : > { %v1162_v27 = vsel %vm699_vm9, %v1154_v12, %v1161_v21  ;;  %v1109_v28 = vrot.slane %v1104_v13, 4  ;;  %v1158_v29 = vperm.slane %v1150_v22, %v3365_v37  ;;  %v1165_v30 = vrot.slane %v1146_v16, 4 }
 0x167   : > { %v1446_v31 = vsel %vm1441_vm10, %v1167_v24, 0  ;;  %v1160_v32 = vsel %vm699_vm9, %v1159_v25, %v1142_v9  ;;  %v1484_v33 = vsel %vm1441_vm10, %v1169_v26, 0  ;;  %v1170_v34 = vpack.c.bf16 %v1162_v27, %v1162_v27 }
 0x168   : > { %v629_v17 = vpop.f32.mrf.mxu0  ;;  %1455 = vmatpush.bf16.xpose.msra.mxu2 %v1446_v31  ;;  %v1168_v35 = vpack.c.bf16 %v1160_v32, %v1160_v32  ;;  %1493 = vmatpush.bf16.xpose.msrb.mxu0 %v1484_v33  ;;  %v1110_v36 = vsel %vm699_vm9, %v1109_v28, %v1092_v5  ;;  %v1163_v39 = vrot.slane %v1158_v29, 4  ;;  %v1112_v40 = vsel %vm699_vm9, %v1104_v13, %v1111_v14 }
 0x169   : > { %v1503_v42 = vsel %vm1441_vm10, %v1170_v34, 0  ;;  %v1171_v43 = vpack.c.bf16 %v1110_v36, %v1110_v36  ;;  %v1173_v44 = vpack.c.bf16 %v1112_v40, %v1112_v40  ;;  %v1166_v45 = vsel %vm699_vm9, %v1158_v29, %v1165_v30 }
 0x16a   : > { %v1465_v46 = vsel %vm1441_vm10, %v1168_v35, 0  ;;  %1512 = vmatpush.bf16.xpose.msrb.mxu1 %v1503_v42  ;;  %v1164_v48 = vsel %vm699_vm9, %v1163_v39, %v1146_v16  ;;  %v1174_v49 = vpack.c.bf16 %v1166_v45, %v1166_v45  ;;  %v630_v55 = vadd.f32 %v629_v17, %v604_v23 }
 0x16b   : > { %1474 = vmatpush.bf16.xpose.msra.mxu3 %v1465_v46  ;;  %v1522_v50 = vsel %vm1441_vm10, %v1171_v43, 0  ;;  %v1172_v51 = vpack.c.bf16 %v1164_v48, %v1164_v48  ;;  %v1560_v52 = vsel %vm1441_vm10, %v1173_v44, 0  ;;  %v671_v59 = vperm.slane %v3334_v41, 4 }
 0x16c   : > { %v1579_v54 = vsel %vm1441_vm10, %v1174_v49, 0  ;;  %v701_v10 = vrot.slane %v630_v55, 4 }
 0x16d   : > { %v1541_v57 = vsel %vm1441_vm10, %v1172_v51, 0 }
 0x170   : > { %v631_v53 = vpop.f32.mrf.mxu0  ;;  %1531 = vmatpush.bf16.xpose.msrb.mxu2 %v1522_v50  ;;  %1569 = vmatpush.bf16.xpose.msra.mxu0 %v1560_v52 }
 0x171   : > { %v632_v56 = vadd.f32 %v631_v53, %v604_v23 }
 0x172   : > { %1588 = vmatpush.bf16.xpose.msra.mxu1 %v1579_v54 }
 0x173   : > { %1550 = vmatpush.bf16.xpose.msrb.mxu3 %v1541_v57  ;;  %v2759_v58 = vpack.i.bf16 %v632_v56, %v630_v55  ;;  %v757_v7 = vrot.slane %v632_v56, 4 }
 0x175   : > { %2760 = vrot.lane.b32.xlu2 %v2759_v58, %s3088_s0  ;;  %2755 = vrot.lane.b32.xlu1 %v2759_v58, %s3087_s20 }
 0x17d   : > { %2765 = vrot.lane.b32.xlu2 %v2759_v58, %s3086_s13 }
 0x185   : > { %673 = vrot.lane.b32.xlu2 %v671_v59, %s3091_s4 }
 0x1cf   : > { %v2761_v60 = vpop.permute.xlu2 %2760 }
 0x1d0   : > { %v2763_v62 = vunpack.i.h.bf16 %v2761_v60  ;;  %v2762_v63 = vunpack.i.l.bf16 %v2761_v60 }
 0x1d2   : > { %v755_v1 = vrot.slane %v2763_v62, 4  ;;  %v698_v3 = vrot.slane %v2762_v63, 4  ;;  %v758_v9 = vsel %vm699_vm9, %v2763_v62, %v757_v7 }
 0x1d3   : > { %v766_v14 = vperm.slane %v758_v9, %v3355_v15 }
 0x1d4   : > { %v756_v41 = vsel %vm699_vm9, %v755_v1, %v632_v56  ;;  %v700_v11 = vsel %vm699_vm9, %v698_v3, %v630_v55 }
 0x1d5   : > { %v706_v16 = vperm.slane %v700_v11, %v3355_v15  ;;  %v793_v31 = vrot.slane %v766_v14, 4 }
 0x1d7   : > { %v2766_v61 = vpop.permute.xlu2 %2765  ;;  %v725_v32 = vrot.slane %v706_v16, 4 }
 0x1d8   : > { %v2768_v12 = vunpack.i.h.bf16 %v2766_v61  ;;  %v2767_v13 = vunpack.i.l.bf16 %v2766_v61 }
 0x1da   : > { %v767_v18 = vrot.slane %v2768_v12, 4  ;;  %v711_v20 = vrot.slane %v2767_v13, 4 }
 0x1df   : > { %v674_v0 = vpop.permute.xlu2 %673 }
 0x1e0   : > { %v676_v5 = vadd.f32 %v674_v0, %v3331_v38  ;;  %v677_v6 = vadd.f32 %v674_v0, %v3338_v47  ;;  %v702_v38 = vsel %vm699_vm9, %v2762_v63, %v701_v10  ;;  %v762_v47 = vperm.slane %v756_v41, %v3355_v15 }
 0x1e1   : > { %v710_v23 = vperm.slane %v702_v38, %v3355_v15 }
 0x1e2   : > { %v3454_v8 = vpack.i.bf16 %v677_v6, %v676_v5  ;;  %v781_v28 = vrot.slane %v762_v47, 4 }
 0x1e3   : > { %v737_v42 = vrot.slane %v710_v23, 4 }
 0x1e4   : > { %2775 = vrot.lane.b32.xlu2 %v3454_v8, %s3088_s0  ;;  %2770 = vrot.lane.b32.xlu0 %v3454_v8, %s3087_s20 }
 0x1e5   : > { %2780 = vrot.lane.b32.xlu1 %v3454_v8, %s3086_s13 }
 0x1e7   : > { %v2756_v17 = vpop.permute.xlu1 %2755 }
 0x1e8   : > { %v2758_v21 = vunpack.i.h.bf16 %v2756_v17  ;;  %v2757_v22 = vunpack.i.l.bf16 %v2756_v17 }
 0x1ea   : > { %v768_v24 = vsel %vm699_vm9, %v767_v18, %v2758_v21  ;;  %v769_v25 = vrot.slane %v2758_v21, 4  ;;  %v712_v26 = vsel %vm699_vm9, %v711_v20, %v2757_v22  ;;  %v713_v27 = vrot.slane %v2757_v22, 4 }
 0x1eb   : > { %v774_v29 = vperm.slane %v768_v24, %v3355_v15  ;;  %v718_v30 = vperm.slane %v712_v26, %v3355_v15 }
 0x1ec   : > { %v770_v33 = vsel %vm699_vm9, %v2768_v12, %v769_v25  ;;  %v714_v34 = vsel %vm699_vm9, %v2767_v13, %v713_v27 }
 0x1ed   : > { %v778_v35 = vperm.slane %v770_v33, %v3355_v15  ;;  %v779_v36 = vrot.slane %v774_v29, 4  ;;  %v782_v39 = vsel %vm699_vm9, %v774_v29, %v781_v28  ;;  %v722_v40 = vperm.slane %v714_v34, %v3355_v15 }
 0x1ee   : > { %v790_v43 = vperm.slane %v782_v39, %v3365_v37  ;;  %v723_v44 = vrot.slane %v718_v30, 4  ;;  %v726_v45 = vsel %vm699_vm9, %v718_v30, %v725_v32 }
 0x1ef   : > { %v780_v46 = vsel %vm699_vm9, %v779_v36, %v762_v47  ;;  %v791_v48 = vrot.slane %v778_v35, 4  ;;  %v794_v49 = vsel %vm699_vm9, %v778_v35, %v793_v31  ;;  %v734_v50 = vperm.slane %v726_v45, %v3365_v37 }
 0x1f0   : > { %v786_v51 = vperm.slane %v780_v46, %v3365_v37  ;;  %v802_v52 = vperm.slane %v794_v49, %v3365_v37  ;;  %v805_v53 = vrot.slane %v790_v43, 4  ;;  %v724_v54 = vsel %vm699_vm9, %v723_v44, %v706_v16 }
 0x1f1   : > { %v792_v55 = vsel %vm699_vm9, %v791_v48, %v766_v14  ;;  %v730_v56 = vperm.slane %v724_v54, %v3365_v37  ;;  %v735_v57 = vrot.slane %v722_v40, 4  ;;  %v738_v58 = vsel %vm699_vm9, %v722_v40, %v737_v42 }
 0x1f2   : > { %v798_v59 = vperm.slane %v792_v55, %v3365_v37  ;;  %v803_v60 = vrot.slane %v786_v51, 4  ;;  %v806_v61 = vsel %vm699_vm9, 0.0, %v805_v53  ;;  %v809_v62 = vrot.slane %v802_v52, 4 }
 0x1f3   : > { %v870_v63 = vrot.slane %v806_v61, 4  ;;  %v736_v0 = vsel %vm699_vm9, %v735_v57, %v710_v23  ;;  %v746_v1 = vperm.slane %v738_v58, %v3365_v37  ;;  %v747_v41 = vrot.slane %v730_v56, 4 }
 0x1f4   : > { %v804_v3 = vsel %vm699_vm9, 0.0, %v803_v60  ;;  %v807_v5 = vrot.slane %v798_v59, 4  ;;  %v810_v6 = vsel %vm699_vm9, 0.0, %v809_v62  ;;  %v742_v10 = vperm.slane %v736_v0, %v3365_v37 }
 0x1f5   : > { %v871_v7 = vsel %vm699_vm9, %v870_v63, %v804_v3  ;;  %v881_v9 = vrot.slane %v810_v6, 4  ;;  %v749_v13 = vrot.slane %v734_v50, 4  ;;  %v865_v38 = vsel %vm699_vm9, %v805_v53, %v786_v51 }
 0x1f6   : > { %v808_v11 = vsel %vm699_vm9, 0.0, %v807_v5  ;;  %v875_v12 = vperm.slane %v871_v7, %v3355_v15  ;;  %v751_v47 = vrot.slane %v742_v10, 4  ;;  %v753_v14 = vrot.slane %v746_v1, 4 }
 0x1f7   : > { %v748_v16 = vsel %vm699_vm9, 0.0, %v747_v41  ;;  %v750_v17 = vsel %vm699_vm9, 0.0, %v749_v13  ;;  %v876_v18 = vsel %vm699_vm9, %v809_v62, %v798_v59  ;;  %v882_v20 = vsel %vm699_vm9, %v881_v9, %v808_v11 }
 0x1f8   : > { %v752_v21 = vsel %vm699_vm9, 0.0, %v751_v47  ;;  %v754_v22 = vsel %vm699_vm9, 0.0, %v753_v14  ;;  %v816_v23 = vrot.slane %v750_v17, 4  ;;  %v869_v24 = vperm.slane %v865_v38, %v3355_v15 }
 0x1f9   : > { %v827_v25 = vrot.slane %v754_v22, 4  ;;  %v886_v26 = vperm.slane %v882_v20, %v3355_v15  ;;  %v887_v27 = vrot.slane %v875_v12, 4  ;;  %v811_v28 = vsel %vm699_vm9, %v749_v13, %v730_v56 }
 0x1fa   : > { %v817_v29 = vsel %vm699_vm9, %v816_v23, %v748_v16  ;;  %v822_v30 = vsel %vm699_vm9, %v753_v14, %v742_v10  ;;  %v880_v31 = vperm.slane %v876_v18, %v3355_v15  ;;  %v815_v40 = vperm.slane %v811_v28, %v3355_v15 }
 0x1fb   : > { %v821_v32 = vperm.slane %v817_v29, %v3355_v15  ;;  %v828_v33 = vsel %vm699_vm9, %v827_v25, %v752_v21  ;;  %v888_v34 = vsel %vm699_vm9, %v887_v27, %v869_v24  ;;  %v899_v35 = vrot.slane %v886_v26, 4 }
 0x1fc   : > { %v832_v36 = vperm.slane %v828_v33, %v3355_v15  ;;  %v894_v39 = vperm.slane %v888_v34, %v3365_v37  ;;  %v826_v44 = vperm.slane %v822_v30, %v3355_v15  ;;  %v889_v49 = vrot.slane %v869_v24, 4 }
 0x1fd   : > { %v833_v42 = vrot.slane %v821_v32, 4  ;;  %v900_v43 = vsel %vm699_vm9, %v899_v35, %v880_v31  ;;  %v901_v56 = vrot.slane %v880_v31, 4  ;;  %v835_v60 = vrot.slane %v815_v40, 4 }
 0x1fe   : > { %v845_v45 = vrot.slane %v832_v36, 4  ;;  %v906_v46 = vperm.slane %v900_v43, %v3365_v37  ;;  %v913_v48 = vrot.slane %v894_v39, 4  ;;  %v890_v63 = vsel %vm699_vm9, %v875_v12, %v889_v49 }
 0x1ff   : > { %v834_v50 = vsel %vm699_vm9, %v833_v42, %v815_v40  ;;  %v847_v0 = vrot.slane %v826_v44, 4  ;;  %v902_v6 = vsel %vm699_vm9, %v886_v26, %v901_v56  ;;  %v898_v9 = vperm.slane %v890_v63, %v3365_v37 }
 0x200   : > { %v840_v51 = vperm.slane %v834_v50, %v3365_v37  ;;  %v846_v52 = vsel %vm699_vm9, %v845_v45, %v826_v44  ;;  %v914_v53 = vsel %vm699_vm9, %v906_v46, %v913_v48  ;;  %v911_v54 = vrot.slane %v906_v46, 4 }
 0x201   : > { %v852_v55 = vperm.slane %v846_v52, %v3365_v37  ;;  %v922_v57 = vpack.c.bf16 %v914_v53, %v914_v53  ;;  %v836_v10 = vsel %vm699_vm9, %v821_v32, %v835_v60  ;;  %v848_v41 = vsel %vm699_vm9, %v832_v36, %v847_v0 }
 0x202   : > { %v859_v58 = vrot.slane %v840_v51, 4  ;;  %v912_v59 = vsel %vm699_vm9, %v911_v54, %v894_v39  ;;  %v910_v11 = vperm.slane %v902_v6, %v3365_v37  ;;  %v844_v12 = vperm.slane %v836_v10, %v3365_v37 }
 0x203   : > { %2578 = vmatmul.msk.bf16.vlgmr.msrb.gmra.mxu1 %vm1441_vm10, %v922_v57  ;;  %v857_v61 = vrot.slane %v852_v55, 4  ;;  %v920_v62 = vpack.c.bf16 %v912_v59, %v912_v59  ;;  %v917_v13 = vrot.slane %v898_v9, 4  ;;  %v856_v38 = vperm.slane %v848_v41, %v3365_v37 }
 0x204   : > { %v860_v1 = vsel %vm699_vm9, %v852_v55, %v859_v58  ;;  %v915_v47 = vrot.slane %v910_v11, 4  ;;  %v863_v14 = vrot.slane %v844_v12, 4 }
 0x205   : > { %v921_v3 = vpack.c.bf16 %v860_v1, %v860_v1  ;;  %v858_v5 = vsel %vm699_vm9, %v857_v61, %v840_v51  ;;  %2576 = vmatmul.msk.bf16.vlgmr.msra.gmra.mxu3 %vm1441_vm10, %v920_v62  ;;  %v918_v16 = vsel %vm699_vm9, %v910_v11, %v917_v13  ;;  %v861_v17 = vrot.slane %v856_v38, 4 }
 0x206   : > { %v919_v7 = vpack.c.bf16 %v858_v5, %v858_v5  ;;  %v916_v18 = vsel %vm699_vm9, %v915_v47, %v898_v9  ;;  %v926_v20 = vpack.c.bf16 %v918_v16, %v918_v16  ;;  %v864_v21 = vsel %vm699_vm9, %v856_v38, %v863_v14 }
 0x207   : > { %2577 = vmatmul.msk.bf16.vlgmr.msrb.gmra.mxu0 %vm1441_vm10, %v921_v3  ;;  %v862_v22 = vsel %vm699_vm9, %v861_v17, %v844_v12  ;;  %v924_v23 = vpack.c.bf16 %v916_v18, %v916_v18  ;;  %v925_v24 = vpack.c.bf16 %v864_v21, %v864_v21 }
 0x208   : > { %2575 = vmatmul.msk.bf16.vlgmr.msra.gmra.mxu2 %vm1441_vm10, %v919_v7  ;;  %v923_v25 = vpack.c.bf16 %v862_v22, %v862_v22 }
 0x213   : > { %2582 = vmatmul.msk.bf16.vlgmr.msra.gmra.mxu1 %vm1441_vm10, %v926_v20 }
 0x215   : > { %2580 = vmatmul.msk.bf16.vlgmr.msrb.gmra.mxu3 %vm1441_vm10, %v924_v23 }
 0x217   : > { %2581 = vmatmul.msk.bf16.vlgmr.msra.gmra.mxu0 %vm1441_vm10, %v925_v24 }
 0x218   : > { %2579 = vmatmul.msk.bf16.vlgmr.msrb.gmra.mxu2 %vm1441_vm10, %v923_v25 }
 0x23e   : > { %v2776_v0 = vpop.permute.xlu2 %2775 }
 0x256   : > { %v2771_v62 = vpop.permute.xlu0 %2770 }
 0x257   : > { %v2781_v63 = vpop.permute.xlu1 %2780 }
 0x280   : > { %v1514_v26 = vpop.f32.mrf.mxu1 }
 0x281   : > { %v1597_v43 = vmul.f32 0.35355338, %v1514_v26 }
 0x283   : > { %v1611_v46 = vsel %vm1441_vm10, %v1597_v43, -inf }
 0x284   : > { %v1495_v27 = vpop.f32.mrf.mxu0 }
 0x285   : > { %v1596_v28 = vmul.f32 0.35355338, %v1495_v27 }
 0x287   : > { %v1608_v29 = vsel %vm1441_vm10, %v1596_v28, -inf }
 0x288   : > { %1609 = vmax.xlane.f32.xlu1 %v1608_v29  ;;  %v1476_v30 = vpop.f32.mrf.mxu3  ;;  %v1516_v31 = vpop.f32.mrf.mxu1 }
 0x289   : > { %v1595_v32 = vmul.f32 0.35355338, %v1476_v30 }
 0x28b   : > { %v1457_v33 = vpop.f32.mrf.mxu2  ;;  %v1605_v34 = vsel %vm1441_vm10, %v1595_v32, -inf }
 0x28c   : > { %v1594_v35 = vmul.f32 0.35355338, %v1457_v33  ;;  %v1497_v36 = vpop.f32.mrf.mxu0  ;;  %1606 = vmax.xlane.f32.xlu2 %v1605_v34 }
 0x28e   : > { %v1602_v39 = vsel %vm1441_vm10, %v1594_v35, -inf }
 0x28f   : > { %1603 = vmax.xlane.f32.xlu0 %v1602_v39 }
 0x290   : > { %v1478_v40 = vpop.f32.mrf.mxu3  ;;  %v1590_v42 = vpop.f32.mrf.mxu1 }
 0x291   : > { %v1601_v59 = vmul.f32 0.35355338, %v1590_v42 }
 0x293   : > { %v1459_v44 = vpop.f32.mrf.mxu2  ;;  %v1623_v61 = vsel %vm1441_vm10, %v1601_v59, -inf }
 0x294   : > { %v1571_v45 = vpop.f32.mrf.mxu0 }
 0x295   : > { %v1600_v51 = vmul.f32 0.35355338, %v1571_v45 }
 0x297   : > { %1612 = vmax.xlane.f32.xlu0 %v1611_v46  ;;  %v1620_v56 = vsel %vm1441_vm10, %v1600_v51, -inf }
 0x298   : > { %v1552_v48 = vpop.f32.mrf.mxu3  ;;  %v1592_v49 = vpop.f32.mrf.mxu1 }
 0x299   : > { %v1599_v50 = vmul.f32 0.35355338, %v1552_v48 }
 0x29b   : > { %v1533_v52 = vpop.f32.mrf.mxu2  ;;  %v1617_v53 = vsel %vm1441_vm10, %v1599_v50, -inf }
 0x29c   : > { %v1598_v54 = vmul.f32 0.35355338, %v1533_v52  ;;  %v1573_v55 = vpop.f32.mrf.mxu0  ;;  %1618 = vmax.xlane.f32.xlu1 %v1617_v53 }
 0x29e   : > { %v1614_v57 = vsel %vm1441_vm10, %v1598_v54, -inf }
 0x29f   : > { %1621 = vmax.xlane.f32.xlu0 %v1620_v56  ;;  %1615 = vmax.xlane.f32.xlu2 %v1614_v57 }
 0x2a0   : > { %v1554_v58 = vpop.f32.mrf.mxu3 }
 0x2a3   : > { %v1535_v60 = vpop.f32.mrf.mxu2 }
 0x2a7   : > { %1624 = vmax.xlane.f32.xlu2 %v1623_v61 }
 0x2b3   : > { %2790 = vrot.lane.b32.xlu0 %v2771_v62, %s3092_s5 }
 0x2b5   : > { %2785 = vrot.lane.b32.xlu1 %v3454_v8, %s3092_s5 }
 0x2bb   : > { %2800 = vrot.lane.b32.xlu0 %v2781_v63, %s3092_s5 }
 0x2bf   : > { %2795 = vrot.lane.b32.xlu2 %v2776_v0, %s3092_s5 }
 0x2fb   : > { %v1610_v1 = vpop.xlane.xlu1 %1609 }
 0x2fc   : > { %v1628_v3 = vsub.f32 %v1596_v28, %v1610_v1 }
 0x2fe   : > { %v1638_v5 = vmul.f32 1.442695, %v1628_v3 }
 0x2ff   : > { %v1607_v6 = vpop.xlane.xlu2 %1606 }
 0x300   : > { %2827 = vpow2.f32 %v1638_v5  ;;  %v1627_v7 = vsub.f32 %v1595_v32, %v1607_v6 }
 0x302   : > { %v1636_v9 = vmul.f32 1.442695, %v1627_v7  ;;  %v1604_v10 = vpop.xlane.xlu0 %1603 }
 0x303   : > { %v1626_v41 = vsub.f32 %v1594_v35, %v1604_v10 }
 0x304   : > { %2829 = vpow2.f32 %v1636_v9 }
 0x305   : > { %v1634_v11 = vmul.f32 1.442695, %v1626_v41 }
 0x306   : > { %v3559_v12 = vpop.eup %2827 }
 0x307   : > { %2831 = vpow2.f32 %v1634_v11  ;;  %v1656_v8 = vsel %vm1441_vm10, %v3559_v12, 0.0 }
 0x308   : > { %1657 = vadd.xlane.f32.xlu0 %v1656_v8 }
 0x30a   : > { %v3563_v13 = vpop.eup %2829  ;;  %v1613_v38 = vpop.xlane.xlu0 %1612 }
 0x30b   : > { %v1629_v47 = vsub.f32 %v1597_v43, %v1613_v38  ;;  %v1653_v14 = vsel %vm1441_vm10, %v3563_v13, 0.0 }
 0x30c   : > { %1654 = vadd.xlane.f32.xlu2 %v1653_v14 }
 0x30d   : > { %v3567_v16 = vpop.eup %2831  ;;  %v1640_v17 = vmul.f32 1.442695, %v1629_v47 }
 0x30e   : > { %v1650_v18 = vsel %vm1441_vm10, %v3567_v16, 0.0 }
 0x30f   : > { %2833 = vpow2.f32 %v1640_v17  ;;  %1651 = vadd.xlane.f32.xlu1 %v1650_v18  ;;  %v1619_v20 = vpop.xlane.xlu1 %1618 }
 0x310   : > { %v1631_v21 = vsub.f32 %v1599_v50, %v1619_v20 }
 0x312   : > { %v1644_v22 = vmul.f32 1.442695, %v1631_v21  ;;  %v1622_v23 = vpop.xlane.xlu0 %1621  ;;  %v1616_v24 = vpop.xlane.xlu2 %1615 }
 0x313   : > { %v1632_v25 = vsub.f32 %v1600_v51, %v1622_v23  ;;  %v1630_v26 = vsub.f32 %v1598_v54, %v1616_v24 }
 0x314   : > { %2835 = vpow2.f32 %v1644_v22 }
 0x315   : > { %v3571_v27 = vpop.eup %2833  ;;  %v1646_v28 = vmul.f32 1.442695, %v1632_v25  ;;  %v1642_v29 = vmul.f32 1.442695, %v1630_v26 }
 0x316   : > { %v1659_v30 = vsel %vm1441_vm10, %v3571_v27, 0.0 }
 0x317   : > { %2837 = vpow2.f32 %v1646_v28  ;;  %1660 = vadd.xlane.f32.xlu1 %v1659_v30 }
 0x318   : > { %2839 = vpow2.f32 %v1642_v29 }
 0x31a   : > { %v3575_v31 = vpop.eup %2835  ;;  %v1625_v32 = vpop.xlane.xlu2 %1624 }
 0x31b   : > { %v1633_v33 = vsub.f32 %v1601_v59, %v1625_v32  ;;  %v1665_v34 = vsel %vm1441_vm10, %v3575_v31, 0.0 }
 0x31c   : > { %1666 = vadd.xlane.f32.xlu0 %v1665_v34 }
 0x31d   : > { %v3579_v35 = vpop.eup %2837  ;;  %v1648_v36 = vmul.f32 1.442695, %v1633_v33 }
 0x31e   : > { %v3581_v39 = vpop.eup %2839  ;;  %v1668_v40 = vsel %vm1441_vm10, %v3579_v35, 0.0 }
 0x31f   : > { %2841 = vpow2.f32 %v1648_v36  ;;  %1669 = vadd.xlane.f32.xlu1 %v1668_v40  ;;  %v1662_v42 = vsel %vm1441_vm10, %v3581_v39, 0.0 }
 0x320   : > { %1663 = vadd.xlane.f32.xlu2 %v1662_v42 }
 0x322   : > { %v2796_v43 = vpop.permute.xlu2 %2795 }
 0x323   : > { %v2797_v45 = vunpack.i.l.bf16 %v2796_v43  ;;  %v2798_v48 = vunpack.i.h.bf16 %v2796_v43 }
 0x325   : > { %v3587_v44 = vpop.eup %2841  ;;  %v2791_v46 = vpop.permute.xlu0 %2790  ;;  %v1213_v53 = vrot.slane %v2797_v45, 4  ;;  %v1269_v55 = vrot.slane %v2798_v48, 4 }
 0x326   : > { %v1671_v49 = vsel %vm1441_vm10, %v3587_v44, 0.0  ;;  %v2793_v54 = vunpack.i.h.bf16 %v2791_v46  ;;  %v2792_v56 = vunpack.i.l.bf16 %v2791_v46 }
 0x327   : > { %v2786_v50 = vpop.permute.xlu1 %2785 }
 0x328   : > { %1672 = vadd.xlane.f32.xlu2 %v1671_v49  ;;  %v2788_v51 = vunpack.i.h.bf16 %v2786_v50  ;;  %v2787_v52 = vunpack.i.l.bf16 %v2786_v50  ;;  %v1283_v63 = vrot.slane %v2793_v54, 4  ;;  %v1227_v5 = vrot.slane %v2792_v56, 4 }
 0x32a   : > { %v1271_v57 = vrot.slane %v2788_v51, 4  ;;  %v1215_v58 = vrot.slane %v2787_v52, 4  ;;  %v1214_v59 = vsel %vm699_vm9, %v1213_v53, %v2787_v52  ;;  %v1270_v61 = vsel %vm699_vm9, %v1269_v55, %v2788_v51 }
 0x32b   : > { %v1220_v6 = vperm.slane %v1214_v59, %v3355_v15  ;;  %v1276_v41 = vperm.slane %v1270_v61, %v3355_v15 }
 0x32c   : > { %v1216_v60 = vsel %vm699_vm9, %v2797_v45, %v1215_v58  ;;  %v1272_v62 = vsel %vm699_vm9, %v2798_v48, %v1271_v57 }
 0x32d   : > { %v1224_v0 = vperm.slane %v1216_v60, %v3355_v15  ;;  %v1280_v1 = vperm.slane %v1272_v62, %v3355_v15  ;;  %v2801_v3 = vpop.permute.xlu0 %2800  ;;  %v1239_v20 = vrot.slane %v1220_v6, 4  ;;  %v1295_v28 = vrot.slane %v1276_v41, 4 }
 0x32e   : > { %v2803_v7 = vunpack.i.h.bf16 %v2801_v3  ;;  %v2802_v9 = vunpack.i.l.bf16 %v2801_v3 }
 0x32f   : > { %v1251_v10 = vrot.slane %v1224_v0, 4  ;;  %v1307_v11 = vrot.slane %v1280_v1, 4 }
 0x330   : > { %v1281_v8 = vrot.slane %v2803_v7, 4  ;;  %v1225_v38 = vrot.slane %v2802_v9, 4  ;;  %v1228_v47 = vsel %vm699_vm9, %v2802_v9, %v1227_v5  ;;  %v1284_v14 = vsel %vm699_vm9, %v2803_v7, %v1283_v63 }
 0x331   : > { %v1236_v17 = vperm.slane %v1228_v47, %v3355_v15  ;;  %v1292_v18 = vperm.slane %v1284_v14, %v3355_v15 }
 0x332   : > { %v1226_v21 = vsel %vm699_vm9, %v1225_v38, %v2792_v56  ;;  %v1282_v22 = vsel %vm699_vm9, %v1281_v8, %v2793_v54 }
 0x333   : > { %v1232_v23 = vperm.slane %v1226_v21, %v3355_v15  ;;  %v1249_v24 = vrot.slane %v1236_v17, 4  ;;  %v1252_v25 = vsel %vm699_vm9, %v1236_v17, %v1251_v10  ;;  %v1288_v26 = vperm.slane %v1282_v22, %v3355_v15 }
 0x334   : > { %v1260_v29 = vperm.slane %v1252_v25, %v3365_v37  ;;  %v1305_v30 = vrot.slane %v1292_v18, 4  ;;  %v1308_v32 = vsel %vm699_vm9, %v1292_v18, %v1307_v11 }
 0x335   : > { %v1237_v33 = vrot.slane %v1232_v23, 4  ;;  %v1240_v34 = vsel %vm699_vm9, %v1232_v23, %v1239_v20  ;;  %v1250_v36 = vsel %vm699_vm9, %v1249_v24, %v1224_v0  ;;  %v1293_v40 = vrot.slane %v1288_v26, 4 }
 0x336   : > { %v1248_v42 = vperm.slane %v1240_v34, %v3365_v37  ;;  %v1256_v43 = vperm.slane %v1250_v36, %v3365_v37  ;;  %v1267_v45 = vrot.slane %v1260_v29, 4  ;;  %v1296_v46 = vsel %vm699_vm9, %v1288_v26, %v1295_v28 }
 0x337   : > { %v1238_v48 = vsel %vm699_vm9, %v1237_v33, %v1220_v6  ;;  %v1294_v49 = vsel %vm699_vm9, %v1293_v40, %v1276_v41  ;;  %v1304_v50 = vperm.slane %v1296_v46, %v3365_v37  ;;  %v1306_v51 = vsel %vm699_vm9, %v1305_v30, %v1280_v1 }
 0x338   : > { %v1244_v52 = vperm.slane %v1238_v48, %v3365_v37  ;;  %v1263_v53 = vrot.slane %v1248_v42, 4  ;;  %v1265_v54 = vrot.slane %v1256_v43, 4  ;;  %v1268_v55 = vsel %vm699_vm9, 0.0, %v1267_v45 }
 0x339   : > { %v1300_v56 = vperm.slane %v1294_v49, %v3365_v37  ;;  %v1312_v57 = vperm.slane %v1306_v51, %v3365_v37  ;;  %v1316_v58 = vperm.slane %v1308_v32, %v3365_v37  ;;  %v1319_v59 = vrot.slane %v1304_v50, 4 }
 0x33a   : > { %v1261_v60 = vrot.slane %v1244_v52, 4  ;;  %v1264_v61 = vsel %vm699_vm9, 0.0, %v1263_v53  ;;  %v1266_v62 = vsel %vm699_vm9, 0.0, %v1265_v54  ;;  %v1336_v63 = vsel %vm699_vm9, %v1267_v45, %v1256_v43 }
 0x33b   : > { %v1317_v0 = vrot.slane %v1300_v56, 4  ;;  %v1320_v1 = vsel %vm699_vm9, 0.0, %v1319_v59  ;;  %v1321_v3 = vrot.slane %v1312_v57, 4  ;;  %v1323_v5 = vrot.slane %v1316_v58, 4 }
 0x33c   : > { %v1262_v6 = vsel %vm699_vm9, 0.0, %v1261_v60  ;;  %v1330_v7 = vrot.slane %v1264_v61, 4  ;;  %v1341_v9 = vrot.slane %v1268_v55, 4  ;;  %v1384_v10 = vrot.slane %v1320_v1, 4 }
 0x33d   : > { %v1318_v41 = vsel %vm699_vm9, 0.0, %v1317_v0  ;;  %v1322_v11 = vsel %vm699_vm9, 0.0, %v1321_v3  ;;  %v1324_v8 = vsel %vm699_vm9, 0.0, %v1323_v5  ;;  %v1390_v38 = vsel %vm699_vm9, %v1323_v5, %v1312_v57 }
 0x33e   : > { %v1342_v47 = vsel %vm699_vm9, %v1341_v9, %v1266_v62  ;;  %v1395_v14 = vrot.slane %v1324_v8, 4  ;;  %v1325_v17 = vsel %vm699_vm9, %v1263_v53, %v1244_v52  ;;  %v1331_v18 = vsel %vm699_vm9, %v1330_v7, %v1262_v6 }
 0x33f   : > { %v1329_v20 = vperm.slane %v1325_v17, %v3355_v15  ;;  %v1335_v21 = vperm.slane %v1331_v18, %v3355_v15  ;;  %v1340_v22 = vperm.slane %v1336_v63, %v3355_v15  ;;  %v1346_v23 = vperm.slane %v1342_v47, %v3355_v15 }
 0x340   : > { %v1396_v24 = vsel %vm699_vm9, %v1395_v14, %v1322_v11  ;;  %v1379_v25 = vsel %vm699_vm9, %v1319_v59, %v1300_v56  ;;  %v1385_v26 = vsel %vm699_vm9, %v1384_v10, %v1318_v41  ;;  %v1394_v28 = vperm.slane %v1390_v38, %v3355_v15 }
 0x341   : > { %v1347_v29 = vrot.slane %v1335_v21, 4  ;;  %v1359_v30 = vrot.slane %v1346_v23, 4  ;;  %v1383_v32 = vperm.slane %v1379_v25, %v3355_v15  ;;  %v1389_v33 = vperm.slane %v1385_v26, %v3355_v15 }
 0x342   : > { %v1400_v34 = vperm.slane %v1396_v24, %v3355_v15  ;;  %v1349_v36 = vrot.slane %v1329_v20, 4  ;;  %v1361_v40 = vrot.slane %v1340_v22, 4  ;;  %v1415_v42 = vrot.slane %v1394_v28, 4 }
 0x343   : > { %v1348_v43 = vsel %vm699_vm9, %v1347_v29, %v1329_v20  ;;  %v1360_v45 = vsel %vm699_vm9, %v1359_v30, %v1340_v22  ;;  %v1401_v46 = vrot.slane %v1389_v33, 4  ;;  %v1403_v48 = vrot.slane %v1383_v32, 4 }
 0x344   : > { %v1354_v49 = vperm.slane %v1348_v43, %v3365_v37  ;;  %v1366_v50 = vperm.slane %v1360_v45, %v3365_v37  ;;  %v1413_v51 = vrot.slane %v1400_v34, 4  ;;  %v1350_v52 = vsel %vm699_vm9, %v1335_v21, %v1349_v36 }
 0x345   : > { %v1402_v53 = vsel %vm699_vm9, %v1401_v46, %v1383_v32  ;;  %v1358_v54 = vperm.slane %v1350_v52, %v3365_v37  ;;  %v1362_v55 = vsel %vm699_vm9, %v1346_v23, %v1361_v40  ;;  %v1404_v56 = vsel %vm699_vm9, %v1389_v33, %v1403_v48 }
 0x346   : > { %v1371_v57 = vrot.slane %v1366_v50, 4  ;;  %v1408_v58 = vperm.slane %v1402_v53, %v3365_v37  ;;  %v1414_v59 = vsel %vm699_vm9, %v1413_v51, %v1394_v28  ;;  %v1373_v60 = vrot.slane %v1354_v49, 4 }
 0x347   : > { %v1420_v61 = vperm.slane %v1414_v59, %v3365_v37  ;;  %v1370_v62 = vperm.slane %v1362_v55, %v3365_v37  ;;  %v1412_v63 = vperm.slane %v1404_v56, %v3365_v37  ;;  %v1416_v0 = vsel %vm699_vm9, %v1400_v34, %v1415_v42 }
 0x348   : > { %v1372_v1 = vsel %vm699_vm9, %v1371_v57, %v1354_v49  ;;  %v1374_v3 = vsel %vm699_vm9, %v1366_v50, %v1373_v60  ;;  %v1427_v5 = vrot.slane %v1408_v58, 4  ;;  %v1424_v6 = vperm.slane %v1416_v0, %v3365_v37 }
 0x349   : > { %v1433_v7 = vpack.c.bf16 %v1372_v1, %v1372_v1  ;;  %v1425_v9 = vrot.slane %v1420_v61, 4  ;;  %v1435_v10 = vpack.c.bf16 %v1374_v3, %v1374_v3  ;;  %v1375_v41 = vrot.slane %v1370_v62, 4 }
 0x34a   : > { %v1428_v11 = vsel %vm699_vm9, %v1420_v61, %v1427_v5  ;;  %v1429_v8 = vrot.slane %v1424_v6, 4  ;;  %v1377_v38 = vrot.slane %v1358_v54, 4  ;;  %v1431_v47 = vrot.slane %v1412_v63, 4 }
 0x34b   : > { %v1703_v14 = vsel %vm1701_vm11, %v1433_v7, 0  ;;  %v1426_v17 = vsel %vm699_vm9, %v1425_v9, %v1408_v58  ;;  %v1741_v18 = vsel %vm1701_vm11, %v1435_v10, 0  ;;  %v1436_v20 = vpack.c.bf16 %v1428_v11, %v1428_v11 }
 0x34c   : > { %1712 = vmatpush.bf16.msra.mxu2 %v1703_v14  ;;  %v1434_v21 = vpack.c.bf16 %v1426_v17, %v1426_v17  ;;  %1750 = vmatpush.bf16.msrb.mxu0 %v1741_v18  ;;  %v1376_v22 = vsel %vm699_vm9, %v1375_v41, %v1358_v54  ;;  %v1430_v23 = vsel %vm699_vm9, %v1429_v8, %v1412_v63 }
 0x34d   : > { %v1760_v24 = vsel %vm1701_vm11, %v1436_v20, 0  ;;  %v1437_v25 = vpack.c.bf16 %v1376_v22, %v1376_v22  ;;  %v1438_v26 = vpack.c.bf16 %v1430_v23, %v1430_v23  ;;  %v1378_v28 = vsel %vm699_vm9, %v1370_v62, %v1377_v38 }
 0x34e   : > { %v1722_v29 = vsel %vm1701_vm11, %v1434_v21, 0  ;;  %1769 = vmatpush.bf16.msrb.mxu1 %v1760_v24  ;;  %v1439_v30 = vpack.c.bf16 %v1378_v28, %v1378_v28  ;;  %v1432_v32 = vsel %vm699_vm9, %v1424_v6, %v1431_v47 }
 0x34f   : > { %1731 = vmatpush.bf16.msra.mxu3 %v1722_v29  ;;  %v1779_v33 = vsel %vm1701_vm11, %v1437_v25, 0  ;;  %v1798_v34 = vsel %vm1701_vm11, %v1438_v26, 0  ;;  %v1440_v36 = vpack.c.bf16 %v1432_v32, %v1432_v32 }
 0x350   : > { %1788 = vmatpush.bf16.msrb.mxu2 %v1779_v33  ;;  %v1817_v40 = vsel %vm1701_vm11, %v1439_v30, 0 }
 0x351   : > { %1826 = vmatpush.bf16.msra.mxu0 %v1817_v40  ;;  %v1836_v42 = vsel %vm1701_vm11, %v1440_v36, 0 }
 0x352   : > { %1845 = vmatpush.bf16.msra.mxu1 %v1836_v42 }
 0x353   : > { %1807 = vmatpush.bf16.msrb.mxu3 %v1798_v34 }
 0x37b   : > { %v1658_v43 = vpop.xlane.xlu0 %1657 }
 0x37c   : > { %2843 = vrcp.f32 %v1658_v43 }
 0x37f   : > { %v1655_v45 = vpop.xlane.xlu2 %1654 }
 0x380   : > { %2845 = vrcp.f32 %v1655_v45 }
 0x382   : > { %v2844_v46 = vpop.eup %2843  ;;  %v1652_v48 = vpop.xlane.xlu1 %1651 }
 0x383   : > { %v1684_v49 = vmul.f32 %v2844_v46, %v3559_v12  ;;  %2847 = vrcp.f32 %v1652_v48 }
 0x385   : > { %v1692_v50 = vpack.c.bf16 %v1684_v49, %v1684_v49 }
 0x386   : > { %v2846_v51 = vpop.eup %2845 }
 0x387   : > { %v1683_v52 = vmul.f32 %v2846_v51, %v3563_v13  ;;  %2585 = vmatmul.msk.bf16.vlgmr.msrb.gmra.mxu0 %vm1441_vm10, %v1692_v50 }
 0x389   : > { %v2848_v53 = vpop.eup %2847  ;;  %v1691_v54 = vpack.c.bf16 %v1683_v52, %v1683_v52 }
 0x38a   : > { %v1682_v55 = vmul.f32 %v2848_v53, %v3567_v16  ;;  %v1661_v56 = vpop.xlane.xlu1 %1660 }
 0x38b   : > { %2849 = vrcp.f32 %v1661_v56  ;;  %2584 = vmatmul.msk.bf16.vlgmr.msra.gmra.mxu3 %vm1441_vm10, %v1691_v54 }
 0x38c   : > { %v1690_v57 = vpack.c.bf16 %v1682_v55, %v1682_v55 }
 0x38e   : > { %2583 = vmatmul.msk.bf16.vlgmr.msra.gmra.mxu2 %vm1441_vm10, %v1690_v57 }
 0x38f   : > { %v1667_v58 = vpop.xlane.xlu0 %1666 }
 0x390   : > { %2851 = vrcp.f32 %v1667_v58 }
 0x391   : > { %v2850_v12 = vpop.eup %2849 }
 0x392   : > { %v1685_v59 = vmul.f32 %v2850_v12, %v3571_v27  ;;  %v1670_v60 = vpop.xlane.xlu1 %1669 }
 0x393   : > { %2853 = vrcp.f32 %v1670_v60  ;;  %v1664_v13 = vpop.xlane.xlu2 %1663 }
 0x394   : > { %v1693_v61 = vpack.c.bf16 %v1685_v59, %v1685_v59  ;;  %2855 = vrcp.f32 %v1664_v13 }
 0x396   : > { %v2852_v62 = vpop.eup %2851  ;;  %2586 = vmatmul.msk.bf16.vlgmr.msrb.gmra.mxu1 %vm1441_vm10, %v1693_v61 }
 0x397   : > { %v1687_v16 = vmul.f32 %v2852_v62, %v3575_v31 }
 0x399   : > { %v2854_v63 = vpop.eup %2853  ;;  %v1695_v0 = vpack.c.bf16 %v1687_v16, %v1687_v16 }
 0x39a   : > { %v2856_v1 = vpop.eup %2855  ;;  %v1688_v3 = vmul.f32 %v2854_v63, %v3579_v35 }
 0x39b   : > { %v1686_v5 = vmul.f32 %v2856_v1, %v3581_v39  ;;  %v1673_v6 = vpop.xlane.xlu2 %1672  ;;  %2588 = vmatmul.msk.bf16.vlgmr.msrb.gmra.mxu3 %vm1441_vm10, %v1695_v0 }
 0x39c   : > { %v1696_v27 = vpack.c.bf16 %v1688_v3, %v1688_v3  ;;  %2857 = vrcp.f32 %v1673_v6 }
 0x39d   : > { %v1694_v7 = vpack.c.bf16 %v1686_v5, %v1686_v5 }
 0x39e   : > { %2589 = vmatmul.msk.bf16.vlgmr.msra.gmra.mxu0 %vm1441_vm10, %v1696_v27 }
 0x39f   : > { %2587 = vmatmul.msk.bf16.vlgmr.msrb.gmra.mxu2 %vm1441_vm10, %v1694_v7 }
 0x3a2   : > { %v2858_v9 = vpop.eup %2857 }
 0x3a3   : > { %v1689_v31 = vmul.f32 %v2858_v9, %v3587_v44 }
 0x3a5   : > { %v1697_v10 = vpack.c.bf16 %v1689_v31, %v1689_v31 }
 0x3a7   : > { %2590 = vmatmul.msk.bf16.vlgmr.msra.gmra.mxu1 %vm1441_vm10, %v1697_v10 }
 0x404   : > { %v1752_v41 = vpop.f32.mrf.mxu0 }
 0x405   : > { %v1865_v14 = vrot.slane %v1752_v41, 4 }
 0x40c   : > { %v1754_v35 = vpop.f32.mrf.mxu0 }
 0x40e   : > { %v1733_v11 = vpop.f32.mrf.mxu3 }
 0x40f   : > { %v1909_v21 = vrot.slane %v1733_v11, 4 }
 0x411   : > { %v1714_v39 = vpop.f32.mrf.mxu2 }
 0x412   : > { %v1853_v30 = vrot.slane %v1714_v39, 4 }
 0x413   : > { %v1771_v8 = vpop.f32.mrf.mxu1 }
 0x414   : > { %v1921_v36 = vrot.slane %v1771_v8, 4 }
 0x416   : > { %v1735_v38 = vpop.f32.mrf.mxu3 }
 0x419   : > { %v1716_v47 = vpop.f32.mrf.mxu2 }
 0x41b   : > { %v1773_v17 = vpop.f32.mrf.mxu1  ;;  %v1828_v18 = vpop.f32.mrf.mxu0 }
 0x41c   : > { %v1863_v20 = vrot.slane %v1828_v18, 4  ;;  %v1866_v22 = vsel %vm699_vm9, %v1828_v18, %v1865_v14 }
 0x41d   : > { %v1874_v28 = vperm.slane %v1866_v22, %v3355_v15 }
 0x41e   : > { %v1864_v23 = vsel %vm699_vm9, %v1863_v20, %v1752_v41  ;;  %v1809_v44 = vpop.f32.mrf.mxu3 }
 0x41f   : > { %v1907_v24 = vrot.slane %v1809_v44, 4  ;;  %v1910_v25 = vsel %vm699_vm9, %v1809_v44, %v1909_v21  ;;  %v1870_v26 = vperm.slane %v1864_v23, %v3355_v15  ;;  %v1887_v46 = vrot.slane %v1874_v28, 4 }
 0x420   : > { %v1918_v29 = vperm.slane %v1910_v25, %v3355_v15 }
 0x421   : > { %v1908_v32 = vsel %vm699_vm9, %v1907_v24, %v1733_v11  ;;  %v1875_v45 = vrot.slane %v1870_v26, 4 }
 0x422   : > { %v1790_v33 = vpop.f32.mrf.mxu2  ;;  %v1914_v34 = vperm.slane %v1908_v32, %v3355_v15  ;;  %v1945_v49 = vrot.slane %v1918_v29, 4 }
 0x423   : > { %v1851_v40 = vrot.slane %v1790_v33, 4  ;;  %v1854_v42 = vsel %vm699_vm9, %v1790_v33, %v1853_v30  ;;  %v1830_v43 = vpop.f32.mrf.mxu0 }
 0x424   : > { %v1862_v48 = vperm.slane %v1854_v42, %v3355_v15  ;;  %v1847_v50 = vpop.f32.mrf.mxu1  ;;  %v1933_v52 = vrot.slane %v1914_v34, 4 }
 0x425   : > { %v1852_v51 = vsel %vm699_vm9, %v1851_v40, %v1714_v39  ;;  %v1919_v53 = vrot.slane %v1847_v50, 4  ;;  %v1922_v54 = vsel %vm699_vm9, %v1847_v50, %v1921_v36 }
 0x426   : > { %v1858_v55 = vperm.slane %v1852_v51, %v3355_v15  ;;  %v1888_v56 = vsel %vm699_vm9, %v1887_v46, %v1862_v48  ;;  %v1889_v57 = vrot.slane %v1862_v48, 4  ;;  %v1930_v58 = vperm.slane %v1922_v54, %v3355_v15  ;;  %v1811_v12 = vpop.f32.mrf.mxu3 }
 0x427   : > { %v1894_v59 = vperm.slane %v1888_v56, %v3365_v37  ;;  %v1920_v60 = vsel %vm699_vm9, %v1919_v53, %v1771_v8 }
 0x428   : > { %v1876_v13 = vsel %vm699_vm9, %v1875_v45, %v1858_v55  ;;  %v1877_v61 = vrot.slane %v1858_v55, 4  ;;  %v1890_v62 = vsel %vm699_vm9, %v1874_v28, %v1889_v57  ;;  %v1926_v16 = vperm.slane %v1920_v60, %v3355_v15 }
 0x429   : > { %v1882_v63 = vperm.slane %v1876_v13, %v3365_v37  ;;  %v1898_v0 = vperm.slane %v1890_v62, %v3365_v37  ;;  %v1903_v1 = vrot.slane %v1894_v59, 4  ;;  %v1943_v3 = vrot.slane %v1930_v58, 4 }
 0x42a   : > { %v1878_v5 = vsel %vm699_vm9, %v1870_v26, %v1877_v61  ;;  %v1931_v6 = vrot.slane %v1926_v16, 4  ;;  %v1934_v27 = vsel %vm699_vm9, %v1926_v16, %v1933_v52  ;;  %v1946_v7 = vsel %vm699_vm9, %v1930_v58, %v1945_v49  ;;  %v1792_v9 = vpop.f32.mrf.mxu2 }
 0x42b   : > { %v1886_v31 = vperm.slane %v1878_v5, %v3365_v37  ;;  %v1899_v10 = vrot.slane %v1882_v63, 4  ;;  %v1904_v41 = vsel %vm699_vm9, 0.0, %v1903_v1  ;;  %v1905_v35 = vrot.slane %v1898_v0, 4 }
 0x42c   : > { %v1932_v11 = vsel %vm699_vm9, %v1931_v6, %v1914_v34  ;;  %v1942_v39 = vperm.slane %v1934_v27, %v3365_v37  ;;  %v1944_v8 = vsel %vm699_vm9, %v1943_v3, %v1918_v29  ;;  %v1954_v38 = vperm.slane %v1946_v7, %v3365_v37  ;;  %v1849_v47 = vpop.f32.mrf.mxu1 }
 0x42d   : > { %v1900_v14 = vsel %vm699_vm9, 0.0, %v1899_v10  ;;  %v1901_v17 = vrot.slane %v1886_v31, 4  ;;  %v1906_v18 = vsel %vm699_vm9, 0.0, %v1905_v35  ;;  %v1974_v20 = vsel %vm699_vm9, %v1905_v35, %v1894_v59 }
 0x42e   : > { %v1978_v21 = vperm.slane %v1974_v20, %v3355_v15  ;;  %v1979_v22 = vrot.slane %v1906_v18, 4  ;;  %v1938_v23 = vperm.slane %v1932_v11, %v3365_v37  ;;  %v1950_v44 = vperm.slane %v1944_v8, %v3365_v37 }
 0x42f   : > { %v1902_v24 = vsel %vm699_vm9, 0.0, %v1901_v17  ;;  %v1963_v25 = vsel %vm699_vm9, %v1901_v17, %v1882_v63  ;;  %v1957_v26 = vrot.slane %v1942_v39, 4  ;;  %v1961_v28 = vrot.slane %v1954_v38, 4 }
 0x430   : > { %v1968_v29 = vrot.slane %v1902_v24, 4  ;;  %v1980_v30 = vsel %vm699_vm9, %v1979_v22, %v1904_v41  ;;  %v1999_v32 = vrot.slane %v1978_v21, 4  ;;  %v1955_v33 = vrot.slane %v1938_v23, 4 }
 0x431   : > { %v1984_v34 = vperm.slane %v1980_v30, %v3355_v15  ;;  %v1958_v36 = vsel %vm699_vm9, 0.0, %v1957_v26  ;;  %v1959_v40 = vrot.slane %v1950_v44, 4  ;;  %v1962_v42 = vsel %vm699_vm9, 0.0, %v1961_v28 }
 0x432   : > { %v2017_v43 = vsel %vm699_vm9, %v1957_v26, %v1938_v23  ;;  %v2022_v45 = vrot.slane %v1958_v36, 4  ;;  %v2028_v46 = vsel %vm699_vm9, %v1961_v28, %v1950_v44  ;;  %v2033_v48 = vrot.slane %v1962_v42, 4  ;;  %v2633_v36 = vld [vmem:[%s419_s11] sm:$0xff] }
 0x433   : > { %v1960_v49 = vsel %vm699_vm9, 0.0, %v1959_v40  ;;  %v2032_v50 = vperm.slane %v2028_v46, %v3355_v15  ;;  %v1956_v51 = vsel %vm699_vm9, 0.0, %v1955_v33  ;;  %v1967_v52 = vperm.slane %v1963_v25, %v3355_v15 }
 0x434   : > { %v2034_v53 = vsel %vm699_vm9, %v2033_v48, %v1960_v49  ;;  %v1969_v54 = vsel %vm699_vm9, %v1968_v29, %v1900_v14  ;;  %v2000_v55 = vsel %vm699_vm9, %v1984_v34, %v1999_v32  ;;  %v2021_v56 = vperm.slane %v2017_v43, %v3355_v15 }
 0x435   : > { %v2038_v57 = vperm.slane %v2034_v53, %v3355_v15  ;;  %v2053_v58 = vrot.slane %v2032_v50, 4  ;;  %v1973_v12 = vperm.slane %v1969_v54, %v3355_v15  ;;  %v1987_v59 = vrot.slane %v1967_v52, 4 }
 0x436   : > { %v2008_v60 = vperm.slane %v2000_v55, %v3365_v37  ;;  %v2023_v13 = vsel %vm699_vm9, %v2022_v45, %v1956_v51  ;;  %v2041_v61 = vrot.slane %v2021_v56, 4  ;;  %v1997_v62 = vrot.slane %v1984_v34, 4 }
 0x437   : > { %v1988_v16 = vsel %vm699_vm9, %v1973_v12, %v1987_v59  ;;  %v2027_v63 = vperm.slane %v2023_v13, %v3355_v15  ;;  %v2054_v0 = vsel %vm699_vm9, %v2038_v57, %v2053_v58  ;;  %v1985_v1 = vrot.slane %v1973_v12, 4  ;;  %v3784_v12 = vld [vmem:[%s3303_s14] sm:$0xff] }
 0x438   : > { %v1996_v3 = vperm.slane %v1988_v16, %v3365_v37  ;;  %v2013_v5 = vrot.slane %v2008_v60, 4  ;;  %v2062_v6 = vperm.slane %v2054_v0, %v3365_v37  ;;  %v1998_v27 = vsel %vm699_vm9, %v1997_v62, %v1978_v21 }
 0x439   : > { %v2042_v7 = vsel %vm699_vm9, %v2027_v63, %v2041_v61  ;;  %v1986_v9 = vsel %vm699_vm9, %v1985_v1, %v1967_v52  ;;  %v2004_v31 = vperm.slane %v1998_v27, %v3365_v37  ;;  %v2039_v10 = vrot.slane %v2027_v63, 4 }
 0x43a   : > { %v2014_v41 = vsel %vm699_vm9, %v2013_v5, %v1996_v3  ;;  %v2050_v15 = vperm.slane %v2042_v7, %v3365_v37  ;;  %v2067_v35 = vrot.slane %v2062_v6, 4  ;;  %v2015_v11 = vrot.slane %v1996_v3, 4 }
 0x43b   : > { %v1992_v39 = vperm.slane %v1986_v9, %v3365_v37  ;;  %v2009_v8 = vrot.slane %v2004_v31, 4  ;;  %v2040_v38 = vsel %vm699_vm9, %v2039_v10, %v2021_v56  ;;  %v2051_v47 = vrot.slane %v2038_v57, 4 }
 0x43c   : > { %v2068_v14 = vsel %vm699_vm9, %v2067_v35, %v2050_v15  ;;  %v2016_v17 = vsel %vm699_vm9, %v2008_v60, %v2015_v11  ;;  %v2069_v18 = vrot.slane %v2050_v15, 4  ;;  %v2046_v20 = vperm.slane %v2040_v38, %v3365_v37  ;;  %v2635_v38 = vld [vmem:[%s429_s9] sm:$0xff] }
 0x43d   : > { %v2809_v21 = vpack.i.bf16 %v2068_v14, %v2014_v41  ;;  %v2011_v22 = vrot.slane %v1992_v39, 4  ;;  %v2052_v23 = vsel %vm699_vm9, %v2051_v47, %v2032_v50  ;;  %v2010_v44 = vsel %vm699_vm9, %v2009_v8, %v1992_v39 }
 0x43e   : > { %v2070_v24 = vsel %vm699_vm9, %v2062_v6, %v2069_v18  ;;  %v2058_v25 = vperm.slane %v2052_v23, %v3365_v37  ;;  %v2065_v26 = vrot.slane %v2046_v20, 4  ;;  %v2634_v37 = vld [vmem:[%s419_s11 + $0x8] sm:$0xff]  ;;  %v2108_v59 = vperm.slane %v3784_v12, 5 }
 0x43f   : > { %2810 = vrot.lane.b32.xlu1 %v2809_v21, %s3093_s10  ;;  %v2814_v28 = vpack.i.bf16 %v2070_v24, %v2016_v17  ;;  %v2012_v29 = vsel %vm699_vm9, %v2004_v31, %v2011_v22  ;;  %2130 = vmatpush.bf16.msra.mxu2 %v2634_v37  ;;  %v2638_v18 = vld [vmem:[%s439_s18 + $0x8] sm:$0xff] }
 0x440   : > { %v2063_v30 = vrot.slane %v2058_v25, 4  ;;  %v2066_v32 = vsel %vm699_vm9, %v2058_v25, %v2065_v26  ;;  %2260 = vmatpush.bf16.msrb.mxu0 %v2638_v18 }
 0x441   : > { %2815 = vrot.lane.b32.xlu2 %v2814_v28, %s3094_s17  ;;  %v2804_v33 = vpack.i.bf16 %v2066_v32, %v2012_v29 }
 0x442   : > { %v2064_v34 = vsel %vm699_vm9, %v2063_v30, %v2046_v20 }
 0x443   : > { %2805 = vrot.lane.b32.xlu0 %v2804_v33, %s3095_s19  ;;  %2131 = vmatpush.bf16.msra.mxu2 %v2633_v36  ;;  %v2190_v36 = vperm.slane %v3784_v12, 6 }
 0x49b   : > { %v2816_v42 = vpop.permute.xlu2 %2815 }
 0x49c   : > { %v2818_v50 = vunpack.i.h.bf16 %v2816_v42  ;;  %v2817_v51 = vunpack.i.l.bf16 %v2816_v42 }
 0x4b1   : > { %v2811_v40 = vpop.permute.xlu1 %2810 }
 0x4b2   : > { %v2813_v48 = vunpack.i.h.bf16 %v2811_v40  ;;  %v2812_v49 = vunpack.i.l.bf16 %v2811_v40 }
 0x4b5   : > { %v2806_v43 = vpop.permute.xlu0 %2805 }
 0x4b6   : > { %v2808_v45 = vunpack.i.h.bf16 %v2806_v43  ;;  %v2807_v46 = vunpack.i.l.bf16 %v2806_v43 }
 0x4b8   : > { %v2096_v52 = vsel %vm1441_vm10, %v2064_v34, %v2808_v45  ;;  %v2095_v53 = vsel %vm1441_vm10, %v2010_v44, %v2807_v46 }
 0x4b9   : > { %v2099_v54 = vsel %vm2097_vm12, %v2096_v52, %v2813_v48  ;;  %v2098_v55 = vsel %vm2097_vm12, %v2095_v53, %v2812_v49  ;;  %v2193_v49 = vperm.slane %v3784_v12, 7 }
 0x4ba   : > { %v2102_v56 = vsel %vm2100_vm13, %v2099_v54, %v2818_v50  ;;  %v2101_v57 = vsel %vm2100_vm13, %v2098_v55, %v2817_v51  ;;  %v2637_v54 = vld [vmem:[%s439_s18] sm:$0xff] }
 0x4bb   : > { %v2103_v58 = vpack.c.bf16 %v2102_v56, %v2101_v57  ;;  %2261 = vmatpush.bf16.msrb.mxu0 %v2637_v54  ;;  %v2270_v55 = vld [vmem:[%s3859_s1] sm:$0xff]  ;;  %v2271_v56 = vld [vmem:[%s3859_s1 + $0x8] sm:$0xff]  ;;  %v3096_v57 = vmov 0  }
 0x4bc   : > { %2819 = vset.pattern.permute.xlu1 %v3096_v57  ;;  %2820 = vset.pattern.permute.xlu0 %v3096_v57 }
 0x4bd   : > { %2599 = vmatmul.msk.bf16.vlgmr.msra.gmra.mxu2 %vm535_vm1, %v2103_v58  ;;  %v3815_v58 = vld [vmem:[%s3303_s14 + $0x8] sm:$0xf] }
 0x540   : > { %v2133_v60 = vpop.f32.mrf.mxu2 }
 0x541   : > { %v2134_v13 = vadd.f32 %v2133_v60, %v2108_v59 }
 0x543   : > { %v2138_v61 = vadd.f32 %v2134_v13, %v3348_v2 }
 0x545   : > { %v2140_v62 = vsel %vm535_vm1, %v2138_v61, 0.0  ;;  %v2148_v16 = vmul.f32 %v2138_v61, %v2138_v61 }
 0x546   : > { %2141 = vadd.xlane.f32.xlu0 %v2140_v62 }
 0x547   : > { %v2150_v63 = vsel %vm535_vm1, %v2148_v16, 0.0 }
 0x548   : > { %v2135_v0 = vpop.f32.mrf.mxu2  ;;  %2151 = vadd.xlane.f32.xlu2 %v2150_v63 }
 0x549   : > { %v2136_v1 = vadd.f32 %v2135_v0, %v2108_v59  ;;  %v2201_v59 = vperm.slane %v3815_v58, 0  ;;  %v2238_v0 = vperm.slane %v3815_v58, 1 }
 0x54b   : > { %v2139_v3 = vadd.f32 %v2136_v1, %v3350_v4  ;;  %v2636_v4 = vld [vmem:[%s429_s9 + $0x8] sm:$0xff] }
 0x54c   : > { %2223 = vmatpush.bf16.msra.mxu3 %v2636_v4 }
 0x54d   : > { %v2143_v5 = vsel %vm535_vm1, %v2139_v3, 0.0  ;;  %v2149_v6 = vmul.f32 %v2139_v3, %v2139_v3 }
 0x54e   : > { %2144 = vadd.xlane.f32.xlu1 %v2143_v5 }
 0x54f   : > { %v2153_v27 = vsel %vm535_vm1, %v2149_v6, 0.0 }
 0x550   : > { %2154 = vadd.xlane.f32.xlu0 %v2153_v27  ;;  %2224 = vmatpush.bf16.msra.mxu3 %v2635_v38 }
 0x564   : > { %2279 = vperm.xlu0 %2820, %v2271_v56  }
 0x567   : > { %2274 = vperm.xlu1 %2819, %v2270_v55  }
 0x5b9   : > { %v2142_v2 = vpop.xlane.xlu0 %2141 }
 0x5ba   : > { %v2146_v7 = vmul.f32 %v2142_v2, %v3323_v19 }
 0x5bb   : > { %v2152_v9 = vpop.xlane.xlu2 %2151 }
 0x5bc   : > { %v2158_v31 = vmul.f32 %v2146_v7, %v2146_v7  ;;  %v2156_v10 = vmul.f32 %v2152_v9, %v3323_v19  ;;  %v2164_v34 = vsub.f32 %v2138_v61, %v2146_v7 }
 0x5be   : > { %v2160_v41 = vsub.f32 %v2156_v10, %v2158_v31 }
 0x5c0   : > { %v2162_v15 = vmax.f32 %v2160_v41, 0.0 }
 0x5c1   : > { %v2145_v35 = vpop.xlane.xlu1 %2144 }
 0x5c2   : > { %v2166_v11 = vadd.f32 1e-08, %v2162_v15  ;;  %v2147_v39 = vmul.f32 %v2145_v35, %v3323_v19 }
 0x5c3   : > { %v2155_v8 = vpop.xlane.xlu0 %2154 }
 0x5c4   : > { %2859 = vrsqrt.f32 %v2166_v11  ;;  %v2159_v47 = vmul.f32 %v2147_v39, %v2147_v39  ;;  %v2157_v14 = vmul.f32 %v2155_v8, %v3323_v19  ;;  %vm2174_vm15 = vweird.f32 %v2166_v11 }
 0x5c5   : > { %v2165_v43 = vsub.f32 %v2139_v3, %v2147_v39 }
 0x5c6   : > { %v2161_v17 = vsub.f32 %v2157_v14, %v2159_v47 }
 0x5c8   : > { %v2163_v20 = vmax.f32 %v2161_v17, 0.0 }
 0x5ca   : > { %v2860_v21 = vpop.eup %2859  ;;  %v2167_v23 = vadd.f32 1e-08, %v2163_v20 }
 0x5cb   : > { %v2169_v22 = vmul.f32 %v2860_v21, %v2166_v11  ;;  %vm2175_vm14 = vweird.f32 %v2860_v21 }
 0x5cc   : > { %2861 = vrsqrt.f32 %v2167_v23  ;;  %vm2176_vm0 = vmor %vm2174_vm15, %vm2175_vm14  ;;  %vm2184_vm3 = vweird.f32 %v2167_v23 }
 0x5cd   : > { %v2170_v44 = vmul.f32 %v2860_v21, %v2169_v22 }
 0x5cf   : > { %v2171_v24 = vmul.f32 0.5, %v2170_v44 }
 0x5d1   : > { %v2172_v25 = vsub.f32 1.5, %v2171_v24 }
 0x5d2   : > { %v2862_v26 = vpop.eup %2861 }
 0x5d3   : > { %v2173_v28 = vmul.f32 %v2860_v21, %v2172_v25  ;;  %v2179_v29 = vmul.f32 %v2862_v26, %v2167_v23  ;;  %vm2185_vm2 = vweird.f32 %v2862_v26 }
 0x5d4   : > { %vm2186_vm4 = vmor %vm2184_vm3, %vm2185_vm2 }
 0x5d5   : > { %v2180_v30 = vmul.f32 %v2862_v26, %v2179_v29  ;;  %v2177_v32 = vsel %vm2176_vm0, %v2860_v21, %v2173_v28 }
 0x5d6   : > { %v2188_v40 = vmul.f32 %v2177_v32, %v2164_v34  ;;  %v2280_v9 = vpop.permute.xlu0 %2279 }
 0x5d7   : > { %v2181_v33 = vmul.f32 0.5, %v2180_v30 }
 0x5d8   : > { %v2191_v46 = vmul.f32 %v2190_v36, %v2188_v40 }
 0x5d9   : > { %v2182_v37 = vsub.f32 1.5, %v2181_v33  ;;  %v2275_v5 = vpop.permute.xlu1 %2274 }
 0x5da   : > { %v2194_v51 = vadd.f32 %v2193_v49, %v2191_v46 }
 0x5db   : > { %v2183_v42 = vmul.f32 %v2862_v26, %v2182_v37 }
 0x5dd   : > { %v2187_v45 = vsel %vm2186_vm4, %v2862_v26, %v2183_v42 }
 0x5de   : > { %v2189_v48 = vmul.f32 %v2187_v45, %v2165_v43 }
 0x5e0   : > { %v2192_v50 = vmul.f32 %v2190_v36, %v2189_v48 }
 0x5e2   : > { %v2195_v52 = vadd.f32 %v2193_v49, %v2192_v50 }
 0x5e4   : > { %v2196_v53 = vpack.c.bf16 %v2195_v52, %v2194_v51 }
 0x5e6   : > { %2608 = vmatmul.msk.bf16.vlgmr.msra.gmra.mxu3 %vm535_vm1, %v2196_v53 }
 0x669   : > { %v2226_v12 = vpop.f32.mrf.mxu3 }
 0x66a   : > { %v2227_v60 = vadd.f32 %v2226_v12, %v2201_v59 }
 0x66c   : > { %v2231_v62 = vmax.f32 %v2227_v60, 0.0 }
 0x671   : > { %v2228_v13 = vpop.f32.mrf.mxu3 }
 0x672   : > { %v2229_v61 = vadd.f32 %v2228_v13, %v2201_v59 }
 0x674   : > { %v2232_v16 = vmax.f32 %v2229_v61, 0.0 }
 0x676   : > { %v2233_v63 = vpack.c.bf16 %v2232_v16, %v2231_v62 }
 0x678   : > { %2617 = vmatmul.msk.bf16.vlgmr.msrb.gmra.mxu0 %vm535_vm1, %v2233_v63 }
 0x6f5   : > { %v2263_v1 = vpop.f32.mrf.mxu0 }
 0x6f6   : > { %v2264_v3 = vadd.f32 %v2263_v1, %v2238_v0 }
 0x6f8   : > { %v2268_v6 = vadd.f32 %v2264_v3, %v2194_v51 }
 0x6fa   : > { %v2282_v27 = vmul.f32 %v2275_v5, %v2268_v6 }
 0x6fc   : > { %2284 = vst.msk [vmem:[#allocation2] sm:$0xff] %vm535_vm1, %v2282_v27 }
 0x6fd   : > { %v2265_v2 = vpop.f32.mrf.mxu0 }
 0x6fe   : > { %v2266_v7 = vadd.f32 %v2265_v2, %v2238_v0 }
 0x700   : > { %v2269_v31 = vadd.f32 %v2266_v7, %v2195_v52  ;;  %2289 = sbr.rel (%p2618_p3) target bundleno = 1957 (0x7a5), region = 76 }
 0x702   : > { %v2283_v10 = vmul.f32 %v2280_v9, %v2269_v31 }
 0x704   : > { %2285 = vst.msk [vmem:[#allocation2 + $0x8] sm:$0xff] %vm535_vm1, %v2283_v10 }
 0x705   : > { %v2290_v41 = vsel %vm535_vm1, %v2282_v27, 0.0  ;;  %v2298_v15 = vmul.f32 %v2282_v27, %v2282_v27  ;;  %v2299_v4 = vmul.f32 %v2283_v10, %v2283_v10  ;;  %v2293_v11 = vsel %vm535_vm1, %v2283_v10, 0.0 }
 0x706   : > { %2291 = vadd.xlane.f32.xlu0 %v2290_v41  ;;  %v2340_v43 = vperm.slane %v3815_v58, 2 }
 0x707   : > { %v2300_v35 = vsel %vm535_vm1, %v2298_v15, 0.0  ;;  %v2303_v39 = vsel %vm535_vm1, %v2299_v4, 0.0 }
 0x708   : > { %2301 = vadd.xlane.f32.xlu1 %v2300_v35 }
 0x70e   : > { %2294 = vadd.xlane.f32.xlu0 %v2293_v11 }
 0x710   : > { %2304 = vadd.xlane.f32.xlu1 %v2303_v39 }
 0x779   : > { %v2292_v8 = vpop.xlane.xlu0 %2291 }
 0x77a   : > { %v2296_v38 = vmul.f32 %v2292_v8, %v3323_v19 }
 0x77b   : > { %v2302_v47 = vpop.xlane.xlu1 %2301 }
 0x77c   : > { %v2308_v14 = vmul.f32 %v2296_v38, %v2296_v38  ;;  %v2306_v17 = vmul.f32 %v2302_v47, %v3323_v19  ;;  %v2314_v42 = vsub.f32 %v2282_v27, %v2296_v38 }
 0x77e   : > { %v2310_v18 = vsub.f32 %v2306_v17, %v2308_v14 }
 0x780   : > { %v2312_v20 = vmax.f32 %v2310_v18, 0.0 }
 0x781   : > { %v2295_v21 = vpop.xlane.xlu0 %2294 }
 0x782   : > { %v2316_v22 = vadd.f32 1e-08, %v2312_v20  ;;  %v2297_v23 = vmul.f32 %v2295_v21, %v3323_v19 }
 0x783   : > { %v2305_v44 = vpop.xlane.xlu1 %2304 }
 0x784   : > { %2864 = vrsqrt.f32 %v2316_v22  ;;  %v2309_v24 = vmul.f32 %v2297_v23, %v2297_v23  ;;  %v2307_v25 = vmul.f32 %v2305_v44, %v3323_v19  ;;  %vm2324_vm6 = vweird.f32 %v2316_v22 }
 0x785   : > { %v2343_v19 = vperm.slane %v3815_v58, 3  ;;  %v2315_v55 = vsub.f32 %v2283_v10, %v2297_v23 }
 0x786   : > { %v2311_v26 = vsub.f32 %v2307_v25, %v2309_v24 }
 0x788   : > { %v2313_v28 = vmax.f32 %v2311_v26, 0.0 }
 0x78a   : > { %v2865_v29 = vpop.eup %2864  ;;  %v2317_v32 = vadd.f32 1e-08, %v2313_v28 }
 0x78b   : > { %v2319_v30 = vmul.f32 %v2865_v29, %v2316_v22  ;;  %vm2325_vm5 = vweird.f32 %v2865_v29 }
 0x78c   : > { %2866 = vrsqrt.f32 %v2317_v32  ;;  %vm2326_vm7 = vmor %vm2324_vm6, %vm2325_vm5  ;;  %vm2334_vm9 = vweird.f32 %v2317_v32 }
 0x78d   : > { %v2320_v33 = vmul.f32 %v2865_v29, %v2319_v30 }
 0x78f   : > { %v2321_v34 = vmul.f32 0.5, %v2320_v33 }
 0x791   : > { %v2322_v37 = vsub.f32 1.5, %v2321_v34 }
 0x792   : > { %v2867_v36 = vpop.eup %2866 }
 0x793   : > { %v2323_v40 = vmul.f32 %v2865_v29, %v2322_v37  ;;  %v2329_v45 = vmul.f32 %v2867_v36, %v2317_v32  ;;  %vm2335_vm8 = vweird.f32 %v2867_v36 }
 0x794   : > { %vm2336_vm10 = vmor %vm2334_vm9, %vm2335_vm8 }
 0x795   : > { %v2327_v46 = vsel %vm2326_vm7, %v2865_v29, %v2323_v40  ;;  %v2330_v49 = vmul.f32 %v2867_v36, %v2329_v45 }
 0x796   : > { %v2338_v48 = vmul.f32 %v2327_v46, %v2314_v42 }
 0x797   : > { %v2331_v51 = vmul.f32 0.5, %v2330_v49 }
 0x798   : > { %v2341_v50 = vmul.f32 %v2340_v43, %v2338_v48 }
 0x799   : > { %v2332_v53 = vsub.f32 1.5, %v2331_v51 }
 0x79a   : > { %v2344_v52 = vadd.f32 %v2343_v19, %v2341_v50 }
 0x79b   : > { %v2333_v54 = vmul.f32 %v2867_v36, %v2332_v53 }
 0x79c   : > { %2346 = vst.msk [vmem:[#allocation11] sm:$0xff] %vm535_vm1, %v2344_v52 }
 0x79d   : > { %v2337_v56 = vsel %vm2336_vm10, %v2867_v36, %v2333_v54 }
 0x79e   : > { %v2339_v57 = vmul.f32 %v2337_v56, %v2315_v55 }
 0x7a0   : > { %v2342_v12 = vmul.f32 %v2340_v43, %v2339_v57 }
 0x7a2   : > { %v2345_v59 = vadd.f32 %v2343_v19, %v2342_v12 }
 0x7a4   : > { %2347 = vst.msk [vmem:[#allocation11 + $0x8] sm:$0xff] %vm535_vm1, %v2345_v59 }
 0x7a5 PF: > { %p2670_p4 = scmp.eq.s32.totalorder %s3222_s21, 1  ;;  %s3893_s18 = sld [smem:[#allocation23_spill]] }
 0x7a6   : > { %s3097_s24 = smov [#allocation11]   ;;  %s3098_s22 = smov 128  }
 0x7a7   : > { %s2356_s25 = sshll.u32 %s3097_s24, 4  ;;  %s2357_s25 = int_to_ptr.vmem [resolvable:$true] %s2356_s25 }
 0x7ab   : > { %s2358_s15 = sshll.u32 %s3893_s18, 4  ;;  %s2359_s15 = int_to_ptr.hbm [resolvable:$true] %s2358_s15 }
 0x7ac   : > { %2650 = dma.vmem_to_hbm [thread:$0]  (%p2670_p4), %s2357_s25, 256, %s2359_s15, [#allocation5], %s3098_s22, %s3098_s22, %s3095_s19  }
 0x7ad   : > { %3053 = dma.done.wait (%p2670_p4), [#allocation5], 256  }
 0x7ae   : > { %3055 = vsyncadd (%p2670_p4), [#allocation5], 4294967040 }
 0x7af PF: > { %s3894_s23 = sld [smem:[#allocation17_spill]]  ;;  %s3898_s27 = smov %s3062_s28 }
 0x7b0   : > { %s3895_s21 = sld [smem:[#allocation19_spill]]  ;;  %s3899_s28 = smov %s3066_s29 }
 0x7b1   : > { %s3896_s30 = sld [smem:[#allocation16_spill]] }
 0x7b2   : > { %s3897_s9 = sld [smem:[#allocation18_spill]] }
 0x7b5   : > { %s26_s10 = sadd.s32 1, %s3894_s23  }
 0x7b6   : > { %p23_p5 = scmp.ge.s32.totalorder %s26_s10, 4   ;;  %s3900_s29 = smov %s3895_s21 }
 0x7b8   :  { %25 = sbr.rel (!%p23_p5) target bundleno = 13 (0xd), region = 140 }
 0x7bd   :  { %2375 = vsyncpa [#allocation4], 1 }
 0x7be   :  { %2377 = vsyncpa [#allocation4 + $0x1], 1 }
 0x7bf   :  { %2378 = vsyncpa [#allocation7], 1 }
 0x7c0   :  { %2380 = vsyncpa [#allocation7 + $0x1], 1 }
 0x7c1   :  { %2381 = vsyncpa [#allocation10], 1 }
 0x7c2   :  { %2383 = vsyncpa [#allocation10 + $0x1], 1 }
 0x7c3   :  { %2384 = vsyncpa [#allocation5], 1 }
 0x7c4   :  { %2386 = vsyncpa [#allocation5 + $0x1], 1 }

</bundles_post_ra>
